<compile_context>
chip_gen: v5e
topology: v5e:2x2
jax: 0.10.0
libtpu: 0.0.40
codegen_flags: <defaults>
</compile_context>

<pallas_src>
import math

import jax
import jax.numpy as jnp
from jax.experimental import pallas as pl
from jax.experimental.pallas import tpu as pltpu

_BN_EPS = 1e-5


def _round_up(x, m):
    return (x + m - 1) // m * m


# ---------------------------------------------------------------------------
# in-kernel helpers
# ---------------------------------------------------------------------------
def _fill_padded(pad_ref, tile, H, W):
    """Write `tile` (H, W, C) into the interior of the (H+2, Wp, C) scratch and
    zero only the 1-pixel halo strips the conv actually reads."""
    _, Wp, C = pad_ref.shape
    dt = pad_ref.dtype
    pad_ref[1:H + 1, 1:W + 1, :] = tile.astype(dt)
    zrow = jnp.zeros((1, Wp, C), dt)
    pad_ref[0:1, :, :] = zrow
    pad_ref[H + 1:H + 2, :, :] = zrow
    zcol = jnp.zeros((H + 2, 1, C), dt)
    pad_ref[:, 0:1, :] = zcol
    pad_ref[:, W + 1:W + 2, :] = zcol


def _build_im2col(pad_ref, patch_ref, H, W):
    """patch_ref (H*W, 9*Cin) <- im2col of pad_ref (H+2, Wp, Cin).

    Per dx only one strided relayout of the padded buffer; the three dy shifts
    are cheap sublane-aligned slices of the flattened column view.  The single
    K=9*Cin matmul that consumes patch_ref replaces 9 K=Cin matmuls and the
    VMEM-round-tripped accumulator of the previous version."""
    Cin = pad_ref.shape[-1]
    for dx in range(3):
        col = pad_ref[:, dx:dx + W, :].reshape((H + 2) * W, Cin)
        for dy in range(3):
            t = 3 * dy + dx
            patch_ref[:, t * Cin:(t + 1) * Cin] = col[dy * W:dy * W + H * W]


def _write_partial_stats(st_ref, a, Cout):
    """Single-pass partial BN statistics: per-channel sum and sum of squares."""
    st_ref[0:1, 0:1, :] = jnp.sum(a, axis=0, keepdims=True).reshape(1, 1, Cout)
    st_ref[0:1, 1:2, :] = jnp.sum(a * a, axis=0, keepdims=True).reshape(1, 1, Cout)


# ---------------------------------------------------------------------------
# kernels
# ---------------------------------------------------------------------------
def _conv1_stats_kernel(x_ref, w_ref, y_ref, st_ref, pad_ref, patch_ref):
    _, H, W, _ = x_ref.shape
    Cout = y_ref.shape[-1]
    _fill_padded(pad_ref, x_ref[0], H, W)
    _build_im2col(pad_ref, patch_ref, H, W)
    a = jnp.dot(patch_ref[...], w_ref[...], preferred_element_type=jnp.float32)
    y_ref[...] = a.reshape(1, H, W, Cout).astype(y_ref.dtype)
    _write_partial_stats(st_ref, a, Cout)


def _bn_relu_conv2_stats_kernel(y1_ref, sb_ref, w_ref, y2_ref, st_ref,
                                pad_ref, patch_ref):
    _, H, W, C = y1_ref.shape
    Cout = y2_ref.shape[-1]
    scale = sb_ref[0:1, :].reshape(1, 1, C)
    bias = sb_ref[1:2, :].reshape(1, 1, C)
    # BN1 affine + ReLU in f32 (v5e-safe), then cast to activation dtype.
    h = jnp.maximum(y1_ref[0].astype(jnp.float32) * scale + bias, 0.0)
    _fill_padded(pad_ref, h, H, W)
    _build_im2col(pad_ref, patch_ref, H, W)
    a = jnp.dot(patch_ref[...], w_ref[...], preferred_element_type=jnp.float32)
    y2_ref[...] = a.reshape(1, H, W, Cout).astype(y2_ref.dtype)
    _write_partial_stats(st_ref, a, Cout)


def _bn2_add_relu_kernel(y2_ref, x_ref, sb_ref, o_ref):
    # Lane-dense layout: activation refs are (B, H, W*C); sb is (2, W*C)
    # (scale/bias pre-tiled over W in the wrapper).  Pure elementwise.
    WC = o_ref.shape[-1]
    scale = sb_ref[0:1, :].reshape(1, 1, WC)
    bias = sb_ref[1:2, :].reshape(1, 1, WC)
    out = jnp.maximum(
        y2_ref[...].astype(jnp.float32) * scale + bias
        + x_ref[...].astype(jnp.float32), 0.0)
    o_ref[...] = out.astype(o_ref.dtype)


# ---------------------------------------------------------------------------
# host-side helpers
# ---------------------------------------------------------------------------
def _bytes(shape, dtype):
    return math.prod(shape) * jnp.dtype(dtype).itemsize


def _vmem_budget():
    """Generation-aware VMEM budget (~3/4 of physical): ~48 MiB on v7x
    (64-MiB parts), ~96 MiB on v5e/v6e (128-MiB parts)."""
    cap = 64 << 20
    try:
        info = pltpu.get_tpu_info()
        cap = int(getattr(info, "vmem_capacity_bytes", cap))
    except Exception:
        pass
    return (cap * 3) // 4


def _compiler_params(block_bytes, scratch_bytes, budget):
    # double-buffered in/out blocks + scratch + margin, clamped to the budget.
    need = 2 * block_bytes + scratch_bytes + (4 << 20)
    limit = int(min(max(need, 16 << 20), max(budget, 16 << 20)))
    return pltpu.CompilerParams(dimension_semantics=("parallel",),
                                vmem_limit_bytes=limit)


def _bn_scale_bias(stats, gamma, beta, count, eps=_BN_EPS):
    """Finalize two-phase BN stats: fold mean/var/gamma/beta into scale+bias.
    Variance is E[x^2]-E[x]^2 in f32 with a clamp at 0 (fine for activation-
    scale data; a shifted sum-of-squares would be more robust if |mean|>>std)."""
    s = jnp.sum(stats[:, 0, :], axis=0)
    ss = jnp.sum(stats[:, 1, :], axis=0)
    mean = s / count
    var = jnp.maximum(ss / count - mean * mean, 0.0)   # biased (training-mode)
    scale = gamma * jax.lax.rsqrt(var + eps)
    bias = beta - mean * scale
    return jnp.stack([scale, bias]).astype(jnp.float32)   # (2, C)


def _conv_cost(N, H, W, Cin, Cout, act_dtype, extra_in_bytes=0):
    asz = jnp.dtype(act_dtype).itemsize
    flops = 2 * N * H * W * 9 * Cin * Cout + 6 * N * H * W * Cout
    bytes_accessed = (N * H * W * Cin * asz + 9 * Cin * Cout * asz
                      + N * H * W * Cout * asz + N * 2 * Cout * 4
                      + extra_in_bytes)
    return pl.CostEstimate(flops=int(flops), transcendentals=0,
                           bytes_accessed=int(bytes_accessed))


def _conv1_call(x, w1_t, act_dtype, budget):
    N, H, W, Cin = x.shape
    Cout = w1_t.shape[-1]
    HW = H * W
    Wp = _round_up(W + 2, 8)
    blk = (_bytes((1, H, W, Cin), act_dtype) + _bytes((9 * Cin, Cout), act_dtype)
           + _bytes((1, H, W, Cout), act_dtype) + _bytes((1, 2, Cout), jnp.float32))
    scr = _bytes((H + 2, Wp, Cin), act_dtype) + _bytes((HW, 9 * Cin), act_dtype)
    return pl.pallas_call(
        _conv1_stats_kernel,
        out_shape=(jax.ShapeDtypeStruct((N, H, W, Cout), act_dtype),
                   jax.ShapeDtypeStruct((N, 2, Cout), jnp.float32)),
        grid_spec=pltpu.PrefetchScalarGridSpec(
            num_scalar_prefetch=0, grid=(N,),
            in_specs=[pl.BlockSpec((1, H, W, Cin), lambda n: (n, 0, 0, 0)),
                      # weight block is n-invariant (fetched once, revisited).
                      pl.BlockSpec((9 * Cin, Cout), lambda n: (0, 0))],
            out_specs=[pl.BlockSpec((1, H, W, Cout), lambda n: (n, 0, 0, 0)),
                       pl.BlockSpec((1, 2, Cout), lambda n: (n, 0, 0))],
            scratch_shapes=[pltpu.VMEM((H + 2, Wp, Cin), act_dtype),
                            pltpu.VMEM((HW, 9 * Cin), act_dtype)]),
        compiler_params=_compiler_params(blk, scr, budget),
        cost_estimate=_conv_cost(N, H, W, Cin, Cout, act_dtype),
    )(x, w1_t)


def _conv2_call(y1, sb1, w2_t, act_dtype, budget):
    N, H, W, C = y1.shape
    Cout = w2_t.shape[-1]
    HW = H * W
    Wp = _round_up(W + 2, 8)
    blk = (_bytes((1, H, W, C), act_dtype) + _bytes((2, C), jnp.float32)
           + _bytes((9 * C, Cout), act_dtype)
           + _bytes((1, H, W, Cout), act_dtype) + _bytes((1, 2, Cout), jnp.float32))
    scr = _bytes((H + 2, Wp, C), act_dtype) + _bytes((HW, 9 * C), act_dtype)
    return pl.pallas_call(
        _bn_relu_conv2_stats_kernel,
        out_shape=(jax.ShapeDtypeStruct((N, H, W, Cout), act_dtype),
                   jax.ShapeDtypeStruct((N, 2, Cout), jnp.float32)),
        grid_spec=pltpu.PrefetchScalarGridSpec(
            num_scalar_prefetch=0, grid=(N,),
            in_specs=[pl.BlockSpec((1, H, W, C), lambda n: (n, 0, 0, 0)),
                      pl.BlockSpec((2, C), lambda n: (0, 0)),
                      pl.BlockSpec((9 * C, Cout), lambda n: (0, 0))],
            out_specs=[pl.BlockSpec((1, H, W, Cout), lambda n: (n, 0, 0, 0)),
                       pl.BlockSpec((1, 2, Cout), lambda n: (n, 0, 0))],
            scratch_shapes=[pltpu.VMEM((H + 2, Wp, C), act_dtype),
                            pltpu.VMEM((HW, 9 * C), act_dtype)]),
        compiler_params=_compiler_params(blk, scr, budget),
        cost_estimate=_conv_cost(N, H, W, C, Cout, act_dtype,
                                 extra_in_bytes=2 * C * 4),
    )(y1, sb1, w2_t)


def _epilogue_call(y2_flat, x_flat, sb2_tiled, out_dtype, budget):
    N, H, WC = y2_flat.shape
    img = (_bytes((1, H, WC), y2_flat.dtype) + _bytes((1, H, WC), x_flat.dtype)
           + _bytes((1, H, WC), out_dtype))

    # B images per grid step: largest divisor of N whose double-buffered
    # footprint fits the budget, preferring an even grid length (v7x: 2 TCs).
    def fits(b):
        return 2 * b * img + _bytes((2, WC), jnp.float32) + (4 << 20) <= budget

    divisors = [d for d in range(1, N + 1) if N % d == 0 and fits(d)] or [1]
    even = [d for d in divisors if (N // d) % 2 == 0]
    B = max(even) if even else max(divisors)

    blk = B * img + _bytes((2, WC), jnp.float32)
    cost = pl.CostEstimate(
        flops=int(4 * N * H * WC), transcendentals=0,
        bytes_accessed=int(N * H * WC * (jnp.dtype(y2_flat.dtype).itemsize
                                         + jnp.dtype(x_flat.dtype).itemsize
                                         + jnp.dtype(out_dtype).itemsize)
                           + 2 * WC * 4))
    return pl.pallas_call(
        _bn2_add_relu_kernel,
        out_shape=jax.ShapeDtypeStruct((N, H, WC), out_dtype),
        grid_spec=pltpu.PrefetchScalarGridSpec(
            num_scalar_prefetch=0, grid=(N // B,),
            in_specs=[pl.BlockSpec((B, H, WC), lambda i: (i, 0, 0)),
                      pl.BlockSpec((B, H, WC), lambda i: (i, 0, 0)),
                      pl.BlockSpec((2, WC), lambda i: (0, 0))],
            out_specs=pl.BlockSpec((B, H, WC), lambda i: (i, 0, 0))),
        compiler_params=_compiler_params(blk, 0, budget),
        cost_estimate=cost,
    )(y2_flat, x_flat, sb2_tiled)


# ---------------------------------------------------------------------------
# forward passes
# ---------------------------------------------------------------------------
def residual_block_nhwc(x, w1_t, w2_t, g1, b1, g2, b2, *,
                        act_dtype=jnp.float32, out_dtype=None):
    """NHWC-native core.  x: (N,H,W,C) in act_dtype; w*_t: (9*C, C) tap-major
    [(dy,dx) row-major, then cin] in act_dtype; g*/b*: (C,) f32."""
    N, H, W, Cin = x.shape
    Cout = w1_t.shape[-1]
    out_dtype = out_dtype or x.dtype
    budget = _vmem_budget()
    count = float(N * H * W)

    # ---- pass A: conv1 + partial BN1 stats --------------------------------
    y1, stats1 = _conv1_call(x, w1_t, act_dtype, budget)
    sb1 = _bn_scale_bias(stats1, g1, b1, count)

    # ---- pass B: bn1 + relu + conv2 + partial BN2 stats --------------------
    y2, stats2 = _conv2_call(y1, sb1, w2_t, act_dtype, budget)
    sb2 = _bn_scale_bias(stats2, g2, b2, count)

    # ---- pass C: bn2 + residual add + relu (lane-dense (N,H,W*C) views) ----
    WC = W * Cout
    out_flat = _epilogue_call(y2.reshape(N, H, WC), x.reshape(N, H, WC),
                              jnp.tile(sb2, (1, W)), out_dtype, budget)
    return out_flat.reshape(N, H, W, Cout)


def residual_block(x_nchw, params, *, act_dtype=jnp.float32):
    """PyTorch-layout adapter (NCHW in/out) for
    ResidualBlock(in_ch=C, out_ch=C, stride=1, downsample=None).
    In an NHWC-native network call residual_block_nhwc directly and the two
    transposes below (an extra HBM round-trip each) disappear."""
    w1, w2 = params["w1"], params["w2"]                     # OIHW
    N, Cin, H, W = x_nchw.shape
    Cout = w1.shape[0]
    assert Cin == Cout, "downsample=None path requires in_channels == out_channels"
    out_dtype = x_nchw.dtype

    x = jnp.transpose(x_nchw, (0, 2, 3, 1)).astype(act_dtype)        # NHWC
    # OIHW -> (9*Cin, Cout): rows ordered tap-major (dy, dx), then cin.
    w1_t = jnp.transpose(w1, (2, 3, 1, 0)).reshape(9 * Cin, Cout).astype(act_dtype)
    w2_t = jnp.transpose(w2, (2, 3, 1, 0)).reshape(9 * Cout, Cout).astype(act_dtype)

    g1 = params["g1"].reshape(Cout).astype(jnp.float32)
    b1 = params["be1"].reshape(Cout).astype(jnp.float32)
    g2 = params["g2"].reshape(Cout).astype(jnp.float32)
    b2 = params["be2"].reshape(Cout).astype(jnp.float32)

    out_nhwc = residual_block_nhwc(x, w1_t, w2_t, g1, b1, g2, b2,
                                   act_dtype=act_dtype, out_dtype=out_dtype)
    return jnp.transpose(out_nhwc, (0, 3, 1, 2))            # back to NCHW


# ---------------------------------------------------------------------------
# pure-JAX reference (mirrors PyTorch training-mode forward)
# ---------------------------------------------------------------------------
def _reference(x_nchw, params, eps=_BN_EPS):
    def conv(x, w):
        return jax.lax.conv_general_dilated(
            x, w, window_strides=(1, 1), padding=((1, 1), (1, 1)),
            dimension_numbers=("NCHW", "OIHW", "NCHW"))

    def bn(x, g, b):
        mean = jnp.mean(x, axis=(0, 2, 3), keepdims=True)
        var = jnp.mean((x - mean) ** 2, axis=(0, 2, 3), keepdims=True)
        xn = (x - mean) * jax.lax.rsqrt(var + eps)
        return xn * g.reshape(1, -1, 1, 1) + b.reshape(1, -1, 1, 1)

    out = jax.nn.relu(bn(conv(x_nchw, params["w1"]), params["g1"], params["be1"]))
    out = bn(conv(out, params["w2"]), params["g2"], params["be2"])
    return jax.nn.relu(out + x_nchw)


if __name__ == "__main__":
    key = jax.random.PRNGKey(0)
    ks = jax.random.split(key, 7)
    N, C, H, W = 4, 4, 16, 16

    x = jax.random.normal(ks[0], (N, C, H, W), jnp.float32)
    params = {
        "w1": 0.1 * jax.random.normal(ks[1], (C, C, 3, 3), jnp.float32),
        "w2": 0.1 * jax.random.normal(ks[2], (C, C, 3, 3), jnp.float32),
        "g1": 1.0 + 0.1 * jax.random.normal(ks[3], (C,), jnp.float32),
        "be1": 0.1 * jax.random.normal(ks[4], (C,), jnp.float32),
        "g2": 1.0 + 0.1 * jax.random.normal(ks[5], (C,), jnp.float32),
        "be2": 0.1 * jax.random.normal(ks[6], (C,), jnp.float32),
    }

    ref = _reference(x, params)

    # f32 activation path (matches PyTorch numerics tightly).
    out = residual_block(x, params)
    jax.block_until_ready(out)
    assert out.shape == (N, C, H, W)
    err_f32 = float(jnp.max(jnp.abs(out - ref)))
    assert jnp.allclose(out, ref, atol=2e-4, rtol=2e-4), f"f32 max abs err {err_f32}"

    # bf16 activation-storage path (recommended default on v6e/v7x).
    out_bf16 = residual_block(x, params, act_dtype=jnp.bfloat16)
    jax.block_until_ready(out_bf16)
    err_bf16 = float(jnp.max(jnp.abs(out_bf16.astype(jnp.float32) - ref)))
    assert jnp.allclose(out_bf16.astype(jnp.float32), ref, atol=2.5e-1, rtol=5e-2), \
        f"bf16 max abs err {err_bf16}"

    print("KERNEL_OK")
</pallas_src>

<mosaic_0001>
module attributes {stable_mosaic.version = 11 : i64} {
  func.func @_conv1_stats_kernel(%arg0: i32, %arg1: memref<1x16x16x4xf32, #tpu.memory_space<vmem>>, %arg2: memref<36x4xf32, #tpu.memory_space<vmem>>, %arg3: memref<1x16x16x4xf32, #tpu.memory_space<vmem>>, %arg4: memref<1x2x4xf32, #tpu.memory_space<vmem>>, %arg5: memref<18x24x4xf32, #tpu.memory_space<vmem>>, %arg6: memref<256x36xf32, #tpu.memory_space<vmem>>) attributes {dimension_semantics = [#tpu.dimension_semantics<parallel>], iteration_bounds = array<i64: 4>, scalar_prefetch = 0 : i64, scratch_operands = 2 : i64, tpu.core_type = #tpu.core_type<tc>, window_params = [{transform_indices = @transform_0, window_bounds = array<i64: 1, 16, 16, 4>}, {pipeline_mode = #tpu.pipeline_mode<synchronous>, transform_indices = @transform_1, window_bounds = array<i64: 36, 4>}, {transform_indices = @transform_2, window_bounds = array<i64: 1, 16, 16, 4>}, {transform_indices = @transform_3, window_bounds = array<i64: 1, 2, 4>}]} {
    %c0 = arith.constant 0 : index
    %c0_0 = arith.constant 0 : index
    %c0_1 = arith.constant 0 : index
    %c0_2 = arith.constant 0 : index
    %0 = vector.load %arg1[%c0, %c0_0, %c0_1, %c0_2] : memref<1x16x16x4xf32, #tpu.memory_space<vmem>>, vector<1x16x16x4xf32>
    %1 = vector.shape_cast %0 : vector<1x16x16x4xf32> to vector<16x16x4xf32>
    %c1 = arith.constant 1 : index
    %c1_3 = arith.constant 1 : index
    %c0_4 = arith.constant 0 : index
    %2 = vector.load %arg5[%c1, %c1_3, %c0_4] : memref<18x24x4xf32, #tpu.memory_space<vmem>>, vector<16x16x4xf32>
    tpu.vector_store %arg5[%c1, %c1_3, %c0_4], %1 {strides = array<i32>} : memref<18x24x4xf32, #tpu.memory_space<vmem>>, vector<16x16x4xf32>,
    %cst = arith.constant 0.000000e+00 : f32
    %3 = vector.broadcast %cst : f32 to vector<1x24x4xf32>
    %c0_5 = arith.constant 0 : index
    %c0_6 = arith.constant 0 : index
    %c0_7 = arith.constant 0 : index
    %4 = vector.load %arg5[%c0_5, %c0_6, %c0_7] : memref<18x24x4xf32, #tpu.memory_space<vmem>>, vector<1x24x4xf32>
    tpu.vector_store %arg5[%c0_5, %c0_6, %c0_7], %3 {strides = array<i32>} : memref<18x24x4xf32, #tpu.memory_space<vmem>>, vector<1x24x4xf32>,
    %c17 = arith.constant 17 : index
    %c0_8 = arith.constant 0 : index
    %c0_9 = arith.constant 0 : index
    %5 = vector.load %arg5[%c17, %c0_8, %c0_9] : memref<18x24x4xf32, #tpu.memory_space<vmem>>, vector<1x24x4xf32>
    tpu.vector_store %arg5[%c17, %c0_8, %c0_9], %3 {strides = array<i32>} : memref<18x24x4xf32, #tpu.memory_space<vmem>>, vector<1x24x4xf32>,
    %cst_10 = arith.constant 0.000000e+00 : f32
    %6 = vector.broadcast %cst_10 : f32 to vector<18x1x4xf32>
    %c0_11 = arith.constant 0 : index
    %c0_12 = arith.constant 0 : index
    %c0_13 = arith.constant 0 : index
    %7 = vector.load %arg5[%c0_11, %c0_12, %c0_13] : memref<18x24x4xf32, #tpu.memory_space<vmem>>, vector<18x1x4xf32>
    tpu.vector_store %arg5[%c0_11, %c0_12, %c0_13], %6 {strides = array<i32>} : memref<18x24x4xf32, #tpu.memory_space<vmem>>, vector<18x1x4xf32>,
    %c0_14 = arith.constant 0 : index
    %c17_15 = arith.constant 17 : index
    %c0_16 = arith.constant 0 : index
    %8 = vector.load %arg5[%c0_14, %c17_15, %c0_16] : memref<18x24x4xf32, #tpu.memory_space<vmem>>, vector<18x1x4xf32>
    tpu.vector_store %arg5[%c0_14, %c17_15, %c0_16], %6 {strides = array<i32>} : memref<18x24x4xf32, #tpu.memory_space<vmem>>, vector<18x1x4xf32>,
    %c0_17 = arith.constant 0 : index
    %c0_18 = arith.constant 0 : index
    %c0_19 = arith.constant 0 : index
    %9 = vector.load %arg5[%c0_17, %c0_18, %c0_19] : memref<18x24x4xf32, #tpu.memory_space<vmem>>, vector<18x16x4xf32>
    %10 = vector.shape_cast %9 : vector<18x16x4xf32> to vector<288x4xf32>
    %11 = vector.extract_strided_slice %10 {offsets = [0, 0], sizes = [256, 4], strides = [1, 1]} : vector<288x4xf32> to vector<256x4xf32>
    %c0_20 = arith.constant 0 : index
    %c0_21 = arith.constant 0 : index
    %12 = vector.load %arg6[%c0_20, %c0_21] : memref<256x36xf32, #tpu.memory_space<vmem>>, vector<256x4xf32>
    tpu.vector_store %arg6[%c0_20, %c0_21], %11 {strides = array<i32>} : memref<256x36xf32, #tpu.memory_space<vmem>>, vector<256x4xf32>,
    %13 = vector.extract_strided_slice %10 {offsets = [16, 0], sizes = [256, 4], strides = [1, 1]} : vector<288x4xf32> to vector<256x4xf32>
    %c0_22 = arith.constant 0 : index
    %c12 = arith.constant 12 : index
    %14 = vector.load %arg6[%c0_22, %c12] : memref<256x36xf32, #tpu.memory_space<vmem>>, vector<256x4xf32>
    tpu.vector_store %arg6[%c0_22, %c12], %13 {strides = array<i32>} : memref<256x36xf32, #tpu.memory_space<vmem>>, vector<256x4xf32>,
    %15 = vector.extract_strided_slice %10 {offsets = [32, 0], sizes = [256, 4], strides = [1, 1]} : vector<288x4xf32> to vector<256x4xf32>
    %c0_23 = arith.constant 0 : index
    %c24 = arith.constant 24 : index
    %16 = vector.load %arg6[%c0_23, %c24] : memref<256x36xf32, #tpu.memory_space<vmem>>, vector<256x4xf32>
    tpu.vector_store %arg6[%c0_23, %c24], %15 {strides = array<i32>} : memref<256x36xf32, #tpu.memory_space<vmem>>, vector<256x4xf32>,
    %c0_24 = arith.constant 0 : index
    %c1_25 = arith.constant 1 : index
    %c0_26 = arith.constant 0 : index
    %17 = vector.load %arg5[%c0_24, %c1_25, %c0_26] : memref<18x24x4xf32, #tpu.memory_space<vmem>>, vector<18x16x4xf32>
    %18 = vector.shape_cast %17 : vector<18x16x4xf32> to vector<288x4xf32>
    %19 = vector.extract_strided_slice %18 {offsets = [0, 0], sizes = [256, 4], strides = [1, 1]} : vector<288x4xf32> to vector<256x4xf32>
    %c0_27 = arith.constant 0 : index
    %c4 = arith.constant 4 : index
    %20 = vector.load %arg6[%c0_27, %c4] : memref<256x36xf32, #tpu.memory_space<vmem>>, vector<256x4xf32>
    tpu.vector_store %arg6[%c0_27, %c4], %19 {strides = array<i32>} : memref<256x36xf32, #tpu.memory_space<vmem>>, vector<256x4xf32>,
    %21 = vector.extract_strided_slice %18 {offsets = [16, 0], sizes = [256, 4], strides = [1, 1]} : vector<288x4xf32> to vector<256x4xf32>
    %c0_28 = arith.constant 0 : index
    %c16 = arith.constant 16 : index
    %22 = vector.load %arg6[%c0_28, %c16] : memref<256x36xf32, #tpu.memory_space<vmem>>, vector<256x4xf32>
    tpu.vector_store %arg6[%c0_28, %c16], %21 {strides = array<i32>} : memref<256x36xf32, #tpu.memory_space<vmem>>, vector<256x4xf32>,
    %23 = vector.extract_strided_slice %18 {offsets = [32, 0], sizes = [256, 4], strides = [1, 1]} : vector<288x4xf32> to vector<256x4xf32>
    %c0_29 = arith.constant 0 : index
    %c28 = arith.constant 28 : index
    %24 = vector.load %arg6[%c0_29, %c28] : memref<256x36xf32, #tpu.memory_space<vmem>>, vector<256x4xf32>
    tpu.vector_store %arg6[%c0_29, %c28], %23 {strides = array<i32>} : memref<256x36xf32, #tpu.memory_space<vmem>>, vector<256x4xf32>,
    %c0_30 = arith.constant 0 : index
    %c2 = arith.constant 2 : index
    %c0_31 = arith.constant 0 : index
    %25 = vector.load %arg5[%c0_30, %c2, %c0_31] : memref<18x24x4xf32, #tpu.memory_space<vmem>>, vector<18x16x4xf32>
    %26 = vector.shape_cast %25 : vector<18x16x4xf32> to vector<288x4xf32>
    %27 = vector.extract_strided_slice %26 {offsets = [0, 0], sizes = [256, 4], strides = [1, 1]} : vector<288x4xf32> to vector<256x4xf32>
    %c0_32 = arith.constant 0 : index
    %c8 = arith.constant 8 : index
    %28 = vector.load %arg6[%c0_32, %c8] : memref<256x36xf32, #tpu.memory_space<vmem>>, vector<256x4xf32>
    tpu.vector_store %arg6[%c0_32, %c8], %27 {strides = array<i32>} : memref<256x36xf32, #tpu.memory_space<vmem>>, vector<256x4xf32>,
    %29 = vector.extract_strided_slice %26 {offsets = [16, 0], sizes = [256, 4], strides = [1, 1]} : vector<288x4xf32> to vector<256x4xf32>
    %c0_33 = arith.constant 0 : index
    %c20 = arith.constant 20 : index
    %30 = vector.load %arg6[%c0_33, %c20] : memref<256x36xf32, #tpu.memory_space<vmem>>, vector<256x4xf32>
    tpu.vector_store %arg6[%c0_33, %c20], %29 {strides = array<i32>} : memref<256x36xf32, #tpu.memory_space<vmem>>, vector<256x4xf32>,
    %31 = vector.extract_strided_slice %26 {offsets = [32, 0], sizes = [256, 4], strides = [1, 1]} : vector<288x4xf32> to vector<256x4xf32>
    %c0_34 = arith.constant 0 : index
    %c32 = arith.constant 32 : index
    %32 = vector.load %arg6[%c0_34, %c32] : memref<256x36xf32, #tpu.memory_space<vmem>>, vector<256x4xf32>
    tpu.vector_store %arg6[%c0_34, %c32], %31 {strides = array<i32>} : memref<256x36xf32, #tpu.memory_space<vmem>>, vector<256x4xf32>,
    %c0_35 = arith.constant 0 : index
    %c0_36 = arith.constant 0 : index
    %33 = vector.load %arg6[%c0_35, %c0_36] : memref<256x36xf32, #tpu.memory_space<vmem>>, vector<256x36xf32>
    %c0_37 = arith.constant 0 : index
    %c0_38 = arith.constant 0 : index
    %34 = vector.load %arg2[%c0_37, %c0_38] : memref<36x4xf32, #tpu.memory_space<vmem>>, vector<36x4xf32>
    %cst_39 = arith.constant dense<0.000000e+00> : vector<256x4xf32>
    %35 = tpu.matmul %33, %34, %cst_39 {dimension_numbers = #tpu.dot_dimension_numbers<[1], [0], [0], [1], [0, 0, 1, 1], [], []>} : vector<256x36xf32>, vector<36x4xf32>, vector<256x4xf32> -> vector<256x4xf32>
    %36 = vector.shape_cast %35 : vector<256x4xf32> to vector<1x16x16x4xf32>
    %c0_40 = arith.constant 0 : index
    %c0_41 = arith.constant 0 : index
    %c0_42 = arith.constant 0 : index
    %c0_43 = arith.constant 0 : index
    %37 = vector.load %arg3[%c0_40, %c0_41, %c0_42, %c0_43] : memref<1x16x16x4xf32, #tpu.memory_space<vmem>>, vector<1x16x16x4xf32>
    tpu.vector_store %arg3[%c0_40, %c0_41, %c0_42, %c0_43], %36 {strides = array<i32>} : memref<1x16x16x4xf32, #tpu.memory_space<vmem>>, vector<1x16x16x4xf32>,
    %cst_44 = arith.constant dense<0.000000e+00> : vector<4xf32>
    %38 = vector.multi_reduction <add>, %35, %cst_44 [0] : vector<256x4xf32> to vector<4xf32>
    %39 = vector.shape_cast %38 : vector<4xf32> to vector<1x4xf32>
    %40 = vector.shape_cast %39 : vector<1x4xf32> to vector<1x1x4xf32>
    %c0_45 = arith.constant 0 : index
    %c0_46 = arith.constant 0 : index
    %c0_47 = arith.constant 0 : index
    %41 = vector.load %arg4[%c0_45, %c0_46, %c0_47] : memref<1x2x4xf32, #tpu.memory_space<vmem>>, vector<1x1x4xf32>
    tpu.vector_store %arg4[%c0_45, %c0_46, %c0_47], %40 {strides = array<i32>} : memref<1x2x4xf32, #tpu.memory_space<vmem>>, vector<1x1x4xf32>,
    %42 = arith.mulf %35, %35 : vector<256x4xf32>
    %cst_48 = arith.constant dense<0.000000e+00> : vector<4xf32>
    %43 = vector.multi_reduction <add>, %42, %cst_48 [0] : vector<256x4xf32> to vector<4xf32>
    %44 = vector.shape_cast %43 : vector<4xf32> to vector<1x4xf32>
    %45 = vector.shape_cast %44 : vector<1x4xf32> to vector<1x1x4xf32>
    %c0_49 = arith.constant 0 : index
    %c1_50 = arith.constant 1 : index
    %c0_51 = arith.constant 0 : index
    %46 = vector.load %arg4[%c0_49, %c1_50, %c0_51] : memref<1x2x4xf32, #tpu.memory_space<vmem>>, vector<1x1x4xf32>
    tpu.vector_store %arg4[%c0_49, %c1_50, %c0_51], %45 {strides = array<i32>} : memref<1x2x4xf32, #tpu.memory_space<vmem>>, vector<1x1x4xf32>,
    return
  }
  func.func @transform_0(%arg0: i32) -> (i32, i32, i32, i32) {
    %c0_i32 = arith.constant 0 : i32
    %c0_i32_0 = arith.constant 0 : i32
    %c0_i32_1 = arith.constant 0 : i32
    %c0_i32_2 = arith.constant 0 : i32
    return %arg0, %c0_i32, %c0_i32_0, %c0_i32_1 : i32, i32, i32, i32
  }
  func.func @transform_1(%arg0: i32) -> (i32, i32) {
    %c0_i32 = arith.constant 0 : i32
    %c0_i32_0 = arith.constant 0 : i32
    %c0_i32_1 = arith.constant 0 : i32
    return %c0_i32, %c0_i32_0 : i32, i32
  }
  func.func @transform_2(%arg0: i32) -> (i32, i32, i32, i32) {
    %c0_i32 = arith.constant 0 : i32
    %c0_i32_0 = arith.constant 0 : i32
    %c0_i32_1 = arith.constant 0 : i32
    %c0_i32_2 = arith.constant 0 : i32
    return %arg0, %c0_i32, %c0_i32_0, %c0_i32_1 : i32, i32, i32, i32
  }
  func.func @transform_3(%arg0: i32) -> (i32, i32, i32) {
    %c0_i32 = arith.constant 0 : i32
    %c0_i32_0 = arith.constant 0 : i32
    %c0_i32_1 = arith.constant 0 : i32
    return %arg0, %c0_i32, %c0_i32_0 : i32, i32, i32
  }
}

</mosaic_0001>

<bundles_post_ra>
// kernel: tpu_custom_call.1
= control target key start
LH: loop header
LB: loop body
LE: loop exit
PB: predicated region body
PF: predicated region fallthrough
CT: control target
= control target key end

     0   :  { %9 = vsyncpa [#allocation5], 0  ;;  %s3777_s0 = inlined_call_operand.vmem [shape: f32[4,16,16,4], index: 0, kind: input, shape index: {}]   ;;  %s3778_s1 = inlined_call_operand.vmem [shape: f32[36,4], index: 1, kind: input, shape index: {}]   ;;  %s3779_s2 = inlined_call_operand.vmem [shape: f32[4,16,16,4], index: 2, kind: output, shape index: {0}]   ;;  %s3780_s3 = inlined_call_operand.hbm [shape: f32[4,2,4], index: 3, kind: output, shape index: {1}]  }
   0x1   :  { %11 = vsyncpa [#allocation5 + $0x1], 0  ;;  %s2337_s12 = smov 0   ;;  %s2339_s13 = smov 0  }
   0x2   :  { %s2341_s14 = smov 0   ;;  %s2343_s15 = smov 0  }
   0x3 LB: > { %s2358_s16 = sadd.s32 4294967295, %s2306_s15   ;;  %s2133_s17 = sadd.s32 4294967294, %s2306_s15   ;;  %s2306_s15 = sphi %s2343_s15, %s3786_s15   ;;  %s2302_s14 = sphi %s2341_s14, %s3785_s14   ;;  %s2298_s13 = sphi %s2339_s13, %s3784_s13   ;;  %s2294_s12 = sphi %s2337_s12, %s3783_s12  }
   0x4   : > { %s2362_s18 = sadd.s32 1, %s2306_s15   ;;  %s97_s19 = sadd.s32 1, %s2302_s14 }
   0x5   : > { %s94_s20 = ssub.s32 %s2306_s15, %s2362_s18  ;;  %p107_p0 = scmp.ne.s32.totalorder %s2302_s14, %s2298_s13 }
   0x6   : > { %p95_p1 = scmp.eq.s32.totalorder %s94_s20, 0  ;;  %p108_p2 = scmp.eq.s32.totalorder %s2358_s16, 3 }
   0x7   : > { %p113_p3 = scmp.ne.s32.totalorder %s2298_s13, %s2294_s12  ;;  %p114_p4 = scmp.eq.s32.totalorder %s2133_s17, 3 }
   0x8   : > { %s2373_s21 = scalar_select %p95_p1, %s2302_s14, %s97_s19  }
   0x9   : > { %p2375_p5 = por %p108_p2, %p107_p0  ;;  %p2379_p6 = por %p114_p4, %p113_p3 }
   0xa   : > { %p2136_p7 = scmp.ge.s32.totalorder %s2306_s15, 1  ;;  %p143_p8 = scmp.lt.s32.totalorder %s2306_s15, 5 }
   0xc   : > { %p144_p9 = pnand %p2136_p7, %p143_p8 }
   0xd   : > { %p172_p10 = scmp.lt.s32.totalorder (!%p144_p9), %s2358_s16, 3  ;;  %s2309_s29 = smov (!%p144_p9), 12  }
   0xe   : > { %147 = sbr.rel (%p144_p9) target bundleno = 1023 (0x3ff), region = 28  ;;  %s2310_s30 = smov (!%p144_p9), 24  }
   0xf   : > { %s2311_s4 = smov (!%p144_p9), 4   ;;  %s2312_s5 = smov (!%p144_p9), 16  }
  0x10   : > { %s2313_s6 = smov (!%p144_p9), 28   ;;  %s2314_s7 = smov (!%p144_p9), 8  }
  0x11   : > { %s2315_s8 = smov (!%p144_p9), 32   ;;  %s2316_s9 = smov (!%p144_p9), 20  }
  0x13   : > { %vm255_vm0 = vcmask 24576   ;;  %vm215_vm1 = vcmask 31744   ;;  %v2308_v0 = vmov 0.0   ;;  %s2388_s24 = scalar_select %p172_p10, %s2358_s16, 3  ;;  %vm488_vm2 = vcmask 130144  }
  0x14   : > { %258 = vst.msk [vmem:[#allocation2 + $0x30] sm:$0x1] %vm255_vm0, %v2308_v0  ;;  %vm619_vm3 = vcmask 228544   ;;  %vm816_vm4 = vcmask 64544   ;;  %vm947_vm5 = vcmask 162944   ;;  %vm1078_vm6 = vcmask 261344  }
  0x15   : > { %248 = vst.msk [vmem:[#allocation2] sm:$0xff] %vm215_vm1, %v2308_v0  ;;  %s2179_s25 = sshll.u32 %s2388_s24, 8  ;;  %vm1704_vm7 = vcmask 1043456   ;;  %vm1275_vm8 = vcmask 97344   ;;  %vm1406_vm9 = vcmask 195744   ;;  %vm1537_vm10 = vcmask 294144  }
  0x16   : > { %249 = vst.msk [vmem:[#allocation2 + $0x8] sm:$0xff] %vm215_vm1, %v2308_v0  ;;  %s2399_s28 = scalar_lea.vmem %s3777_s0, %s2179_s25  ;;  %vm1607_vm11 = vcmask 293888   ;;  %s3481_s10 = scalar_lea.vmem %s3779_s2, %s2179_s25 }
  0x17   : > { %250 = vst.msk [vmem:[#allocation2 + $0x10] sm:$0xff] %vm215_vm1, %v2308_v0  ;;  %v184_v1 = vld [vmem:[%s2399_s28 + $0x10] sm:$0xff]  ;;  %v182_v3 = vld [vmem:[%s2399_s28] sm:$0xff]  ;;  %v185_v4 = vld [vmem:[%s2399_s28 + $0x18] sm:$0xff]  ;;  %s169_s24 = sand.u32 1, %s2298_s13  }
  0x18   : > { %252 = vst.msk [vmem:[#allocation2 + $0x198] sm:$0xff] %vm215_vm1, %v2308_v0  ;;  %v183_v5 = vld [vmem:[%s2399_s28 + $0x8] sm:$0xff]  ;;  %v188_v6 = vld [vmem:[%s2399_s28 + $0x30] sm:$0xff]  ;;  %v189_v7 = vld [vmem:[%s2399_s28 + $0x38] sm:$0xff]  ;;  %s2137_s25 = sshll.u32 %s169_s24, 1 }
  0x19   : > { %253 = vst.msk [vmem:[#allocation2 + $0x1a0] sm:$0xff] %vm215_vm1, %v2308_v0  ;;  %v186_v9 = vld [vmem:[%s2399_s28 + $0x20] sm:$0xff]  ;;  %v192_v10 = vld [vmem:[%s2399_s28 + $0x50] sm:$0xff]  ;;  %v191_v14 = vld [vmem:[%s2399_s28 + $0x48] sm:$0xff]  ;;  %s171_s11 = scalar_lea.vmem [#allocation4], %s2137_s25 }
  0x1a   : > { %218 = vst.msk [vmem:[#allocation2 + $0x31] sm:$0xff] %vm215_vm1, %v184_v1  ;;  %v190_v11 = vld [vmem:[%s2399_s28 + $0x40] sm:$0xff]  ;;  %v187_v18 = vld [vmem:[%s2399_s28 + $0x28] sm:$0xff]  ;;  %v196_v25 = vld [vmem:[%s2399_s28 + $0x70] sm:$0xff]  ;;  %s2046_s17 = sshll.u32 %s171_s11, 4  ;;  %s2047_s17 = int_to_ptr.vmem [resolvable:$true] %s2046_s17 }
  0x1b   : > { %254 = vst.msk [vmem:[#allocation2 + $0x1a8] sm:$0xff] %vm215_vm1, %v2308_v0  ;;  %v194_v20 = vld [vmem:[%s2399_s28 + $0x60] sm:$0xff]  ;;  %v195_v21 = vld [vmem:[%s2399_s28 + $0x68] sm:$0xff]  ;;  %v197_v26 = vld [vmem:[%s2399_s28 + $0x78] sm:$0xff] }
  0x1c   : > { %257 = vst.msk [vmem:[#allocation2 + $0x18] sm:$0x1] %vm255_vm0, %v2308_v0  ;;  %v198_v23 = vld [vmem:[%s2399_s28 + $0x80] sm:$0xff]  ;;  %v193_v29 = vld [vmem:[%s2399_s28 + $0x58] sm:$0xff]  ;;  %v200_v31 = vld [vmem:[%s2399_s28 + $0x90] sm:$0xff] }
  0x1d   : > { %259 = vst.msk [vmem:[#allocation2 + $0x48] sm:$0x1] %vm255_vm0, %v2308_v0  ;;  %v201_v32 = vld [vmem:[%s2399_s28 + $0x98] sm:$0xff]  ;;  %v204_v35 = vld [vmem:[%s2399_s28 + $0xb0] sm:$0xff]  ;;  %v202_v37 = vld [vmem:[%s2399_s28 + $0xa0] sm:$0xff] }
  0x1e   : > { %260 = vst.msk [vmem:[#allocation2 + $0x60] sm:$0x1] %vm255_vm0, %v2308_v0  ;;  %v203_v39 = vld [vmem:[%s2399_s28 + $0xa8] sm:$0xff]  ;;  %v206_v43 = vld [vmem:[%s2399_s28 + $0xc0] sm:$0xff]  ;;  %v208_v48 = vld [vmem:[%s2399_s28 + $0xd0] sm:$0xff] }
  0x1f   : > { %261 = vst.msk [vmem:[#allocation2 + $0x78] sm:$0x1] %vm255_vm0, %v2308_v0  ;;  %v199_v41 = vld [vmem:[%s2399_s28 + $0x88] sm:$0xff]  ;;  %v210_v46 = vld [vmem:[%s2399_s28 + $0xe0] sm:$0xff]  ;;  %v209_v51 = vld [vmem:[%s2399_s28 + $0xd8] sm:$0xff] }
  0x20   : > { %262 = vst.msk [vmem:[#allocation2 + $0x90] sm:$0x1] %vm255_vm0, %v2308_v0  ;;  %v207_v44 = vld [vmem:[%s2399_s28 + $0xc8] sm:$0xff]  ;;  %v205_v53 = vld [vmem:[%s2399_s28 + $0xb8] sm:$0xff]  ;;  %v212_v55 = vld [vmem:[%s2399_s28 + $0xf0] sm:$0xff] }
  0x21   : > { %v2411_v2 = vld [vmem:[#allocation2 + $0x30] sm:$0xff]  ;;  %263 = vst.msk [vmem:[#allocation2 + $0xa8] sm:$0x1] %vm255_vm0, %v2308_v0  ;;  %v213_v57 = vld [vmem:[%s2399_s28 + $0xf8] sm:$0xff]  ;;  %v211_v58 = vld [vmem:[%s2399_s28 + $0xe8] sm:$0xff] }
  0x22   : > { %396 = vrot.lane.b32.xlu1 %v2411_v2, %s2309_s29  ;;  %264 = vst.msk [vmem:[#allocation2 + $0xc0] sm:$0x1] %vm255_vm0, %v2308_v0 }
  0x23   : > { %265 = vst.msk [vmem:[#allocation2 + $0xd8] sm:$0x1] %vm255_vm0, %v2308_v0 }
  0x24   : > { %266 = vst.msk [vmem:[#allocation2 + $0xf0] sm:$0x1] %vm255_vm0, %v2308_v0 }
  0x25   : > { %267 = vst.msk [vmem:[#allocation2 + $0x108] sm:$0x1] %vm255_vm0, %v2308_v0 }
  0x26   : > { %268 = vst.msk [vmem:[#allocation2 + $0x120] sm:$0x1] %vm255_vm0, %v2308_v0 }
  0x27   : > { %269 = vst.msk [vmem:[#allocation2 + $0x138] sm:$0x1] %vm255_vm0, %v2308_v0 }
  0x28   : > { %270 = vst.msk [vmem:[#allocation2 + $0x150] sm:$0x1] %vm255_vm0, %v2308_v0 }
  0x29   : > { %271 = vst.msk [vmem:[#allocation2 + $0x168] sm:$0x1] %vm255_vm0, %v2308_v0 }
  0x2a   : > { %272 = vst.msk [vmem:[#allocation2 + $0x180] sm:$0x1] %vm255_vm0, %v2308_v0 }
  0x2b   : > { %275 = vst.msk [vmem:[#allocation2 + $0x29] sm:$0x1] %vm255_vm0, %v2308_v0 }
  0x2c   : > { %276 = vst.msk [vmem:[#allocation2 + $0x41] sm:$0x1] %vm255_vm0, %v2308_v0 }
  0x2d   : > { %277 = vst.msk [vmem:[#allocation2 + $0x59] sm:$0x1] %vm255_vm0, %v2308_v0 }
  0x2e   : > { %278 = vst.msk [vmem:[#allocation2 + $0x71] sm:$0x1] %vm255_vm0, %v2308_v0 }
  0x2f   : > { %279 = vst.msk [vmem:[#allocation2 + $0x89] sm:$0x1] %vm255_vm0, %v2308_v0 }
  0x30   : > { %280 = vst.msk [vmem:[#allocation2 + $0xa1] sm:$0x1] %vm255_vm0, %v2308_v0 }
  0x31   : > { %281 = vst.msk [vmem:[#allocation2 + $0xb9] sm:$0x1] %vm255_vm0, %v2308_v0 }
  0x32   : > { %282 = vst.msk [vmem:[#allocation2 + $0xd1] sm:$0x1] %vm255_vm0, %v2308_v0 }
  0x33   : > { %283 = vst.msk [vmem:[#allocation2 + $0xe9] sm:$0x1] %vm255_vm0, %v2308_v0 }
  0x34   : > { %284 = vst.msk [vmem:[#allocation2 + $0x101] sm:$0x1] %vm255_vm0, %v2308_v0 }
  0x35   : > { %285 = vst.msk [vmem:[#allocation2 + $0x119] sm:$0x1] %vm255_vm0, %v2308_v0 }
  0x36   : > { %286 = vst.msk [vmem:[#allocation2 + $0x131] sm:$0x1] %vm255_vm0, %v2308_v0 }
  0x37   : > { %287 = vst.msk [vmem:[#allocation2 + $0x149] sm:$0x1] %vm255_vm0, %v2308_v0 }
  0x38   : > { %288 = vst.msk [vmem:[#allocation2 + $0x161] sm:$0x1] %vm255_vm0, %v2308_v0 }
  0x39   : > { %289 = vst.msk [vmem:[#allocation2 + $0x179] sm:$0x1] %vm255_vm0, %v2308_v0 }
  0x3a   : > { %290 = vst.msk [vmem:[#allocation2 + $0x191] sm:$0x1] %vm255_vm0, %v2308_v0 }
  0x3b   : > { %332 = vst.msk [vmem:[#allocation3 + $0x20] sm:$0xff] %vm215_vm1, %v2411_v2 }
  0x3c   : > { %216 = vst.msk [vmem:[#allocation2 + $0x19] sm:$0xff] %vm215_vm1, %v182_v3 }
  0x3d   : > { %256 = vst.msk [vmem:[#allocation2] sm:$0x1] %vm255_vm0, %v2308_v0 }
  0x3e   : > { %273 = vst.msk [vmem:[#allocation2 + $0x198] sm:$0x1] %vm255_vm0, %v2308_v0 }
  0x3f   : > { %274 = vst.msk [vmem:[#allocation2 + $0x11] sm:$0x1] %vm255_vm0, %v2308_v0 }
  0x40   : > { %291 = vst.msk [vmem:[#allocation2 + $0x1a9] sm:$0x1] %vm255_vm0, %v2308_v0 }
  0x41   : > { %219 = vst.msk [vmem:[#allocation2 + $0x39] sm:$0xff] %vm215_vm1, %v185_v4  ;;  %v293_v4 = vld [vmem:[#allocation2 + $0x8] sm:$0xff] }
  0x42   : > { %217 = vst.msk [vmem:[#allocation2 + $0x21] sm:$0xff] %vm215_vm1, %v183_v5 }
  0x43   : > { %v294_v8 = vld [vmem:[#allocation2 + $0x18] sm:$0xff]  ;;  %222 = vst.msk [vmem:[#allocation2 + $0x61] sm:$0xff] %vm215_vm1, %v188_v6 }
  0x44   : > { %392 = vrot.lane.b32.xlu0 %v294_v8, %s2309_s29  ;;  %330 = vst.msk [vmem:[#allocation3 + $0x10] sm:$0xff] %vm215_vm1, %v294_v8  ;;  %v292_v3 = vld [vmem:[#allocation2] sm:$0xff] }
  0x45   : > { %223 = vst.msk [vmem:[#allocation2 + $0x69] sm:$0xff] %vm215_vm1, %v189_v7 }
  0x46   : > { %220 = vst.msk [vmem:[#allocation2 + $0x49] sm:$0xff] %vm215_vm1, %v186_v9 }
  0x47   : > { %226 = vst.msk [vmem:[#allocation2 + $0x91] sm:$0xff] %vm215_vm1, %v192_v10 }
  0x48   : > { %v2464_v12 = vld [vmem:[#allocation2 + $0x38] sm:$0xff]  ;;  %224 = vst.msk [vmem:[#allocation2 + $0x79] sm:$0xff] %vm215_vm1, %v190_v11 }
  0x49   : > { %398 = vrot.lane.b32.xlu1 %v2464_v12, %s2309_s29  ;;  %333 = vst.msk [vmem:[#allocation3 + $0x28] sm:$0xff] %vm215_vm1, %v2464_v12  ;;  %v295_v13 = vld [vmem:[#allocation2 + $0x20] sm:$0xff] }
  0x4a   : > { %331 = vst.msk [vmem:[#allocation3 + $0x18] sm:$0xff] %vm215_vm1, %v295_v13  ;;  %v2473_v15 = vld [vmem:[#allocation2 + $0x60] sm:$0xff] }
  0x4b   : > { %336 = vst.msk [vmem:[#allocation3 + $0x40] sm:$0xff] %vm215_vm1, %v2473_v15 }
  0x4c   : > { %394 = vrot.lane.b32.xlu0 %v295_v13, %s2309_s29  ;;  %v2478_v16 = vld [vmem:[#allocation2 + $0x68] sm:$0xff]  ;;  %225 = vst.msk [vmem:[#allocation2 + $0x81] sm:$0xff] %vm215_vm1, %v191_v14 }
  0x4d   : > { %337 = vst.msk [vmem:[#allocation3 + $0x48] sm:$0xff] %vm215_vm1, %v2478_v16  ;;  %v2483_v17 = vld [vmem:[#allocation2 + $0x48] sm:$0xff] }
  0x4e   : > { %400 = vrot.lane.b32.xlu2 %v2483_v17, %s2309_s29  ;;  %334 = vst.msk [vmem:[#allocation3 + $0x30] sm:$0xff] %vm215_vm1, %v2483_v17  ;;  %v2490_v19 = vld [vmem:[#allocation2 + $0x90] sm:$0xff] }
  0x4f   : > { %340 = vst.msk [vmem:[#allocation3 + $0x60] sm:$0xff] %vm215_vm1, %v2490_v19  ;;  %v2501_v22 = vld [vmem:[#allocation2 + $0x78] sm:$0xff] }
  0x50   : > { %221 = vst.msk [vmem:[#allocation2 + $0x51] sm:$0xff] %vm215_vm1, %v187_v18 }
  0x51   : > { %406 = vrot.lane.b32.xlu1 %v2478_v16, %s2309_s29  ;;  %228 = vst.msk [vmem:[#allocation2 + $0xa9] sm:$0xff] %vm215_vm1, %v194_v20 }
  0x52   : > { %229 = vst.msk [vmem:[#allocation2 + $0xb1] sm:$0xff] %vm215_vm1, %v195_v21 }
  0x53   : > { %v2504_v24 = vld [vmem:[#allocation2 + $0x80] sm:$0xff]  ;;  %338 = vst.msk [vmem:[#allocation3 + $0x50] sm:$0xff] %vm215_vm1, %v2501_v22 }
  0x54   : > { %404 = vrot.lane.b32.xlu0 %v2473_v15, %s2309_s29  ;;  %339 = vst.msk [vmem:[#allocation3 + $0x58] sm:$0xff] %vm215_vm1, %v2504_v24 }
  0x55   : > { %232 = vst.msk [vmem:[#allocation2 + $0xd9] sm:$0xff] %vm215_vm1, %v198_v23 }
  0x56   : > { %230 = vst.msk [vmem:[#allocation2 + $0xc1] sm:$0xff] %vm215_vm1, %v196_v25  ;;  %v652_v25 = vld [vmem:[#allocation2 + $0x1] sm:$0xff] }
  0x57   : > { %v2516_v27 = vld [vmem:[#allocation2 + $0x50] sm:$0xff]  ;;  %231 = vst.msk [vmem:[#allocation2 + $0xc9] sm:$0xff] %vm215_vm1, %v197_v26  ;;  %v327_v26 = vld [vmem:[#allocation2 + $0x1a0] sm:$0xff] }
  0x58   : > { %402 = vrot.lane.b32.xlu2 %v2516_v27, %s2309_s29  ;;  %335 = vst.msk [vmem:[#allocation3 + $0x38] sm:$0xff] %vm215_vm1, %v2516_v27  ;;  %v2523_v28 = vld [vmem:[#allocation2 + $0xa8] sm:$0xff] }
  0x59   : > { %412 = vrot.lane.b32.xlu1 %v2490_v19, %s2309_s29  ;;  %v2528_v30 = vld [vmem:[#allocation2 + $0xb0] sm:$0xff]  ;;  %342 = vst.msk [vmem:[#allocation3 + $0x70] sm:$0xff] %vm215_vm1, %v2523_v28 }
  0x5a   : > { %343 = vst.msk [vmem:[#allocation3 + $0x78] sm:$0xff] %vm215_vm1, %v2528_v30 }
  0x5b   : > { %227 = vst.msk [vmem:[#allocation2 + $0x99] sm:$0xff] %vm215_vm1, %v193_v29  ;;  %v326_v29 = vld [vmem:[#allocation2 + $0x198] sm:$0xff] }
  0x5c   : > { %410 = vrot.lane.b32.xlu0 %v2504_v24, %s2309_s29  ;;  %v2539_v33 = vld [vmem:[#allocation2 + $0xd8] sm:$0xff]  ;;  %234 = vst.msk [vmem:[#allocation2 + $0xf1] sm:$0xff] %vm215_vm1, %v200_v31  ;;  %v2771_v31 = vld [vmem:[#allocation2 + $0x21] sm:$0xff] }
  0x5d   : > { %346 = vst.msk [vmem:[#allocation3 + $0x90] sm:$0xff] %vm215_vm1, %v2539_v33  ;;  %v2550_v36 = vld [vmem:[#allocation2 + $0xc0] sm:$0xff] }
  0x5e   : > { %v2544_v34 = vld [vmem:[#allocation2 + $0xc8] sm:$0xff]  ;;  %235 = vst.msk [vmem:[#allocation2 + $0xf9] sm:$0xff] %vm215_vm1, %v201_v32  ;;  %v2777_v32 = vld [vmem:[#allocation2 + $0x19] sm:$0xff] }
  0x5f   : > { %345 = vst.msk [vmem:[#allocation3 + $0x88] sm:$0xff] %vm215_vm1, %v2544_v34 }
  0x60   : > { %408 = vrot.lane.b32.xlu2 %v2501_v22, %s2309_s29  ;;  %344 = vst.msk [vmem:[#allocation3 + $0x80] sm:$0xff] %vm215_vm1, %v2550_v36 }
  0x61   : > { %418 = vrot.lane.b32.xlu1 %v2528_v30, %s2309_s29  ;;  %238 = vst.msk [vmem:[#allocation2 + $0x121] sm:$0xff] %vm215_vm1, %v204_v35  ;;  %v653_v35 = vld [vmem:[#allocation2 + $0x9] sm:$0xff] }
  0x62   : > { %v2560_v38 = vld [vmem:[#allocation2 + $0x98] sm:$0xff]  ;;  %236 = vst.msk [vmem:[#allocation2 + $0x109] sm:$0xff] %vm215_vm1, %v202_v37  ;;  %v2783_v37 = vld [vmem:[#allocation2 + $0x49] sm:$0xff] }
  0x63   : > { %341 = vst.msk [vmem:[#allocation3 + $0x68] sm:$0xff] %vm215_vm1, %v2560_v38  ;;  %v2566_v40 = vld [vmem:[#allocation2 + $0xf0] sm:$0xff] }
  0x64   : > { %416 = vrot.lane.b32.xlu0 %v2523_v28, %s2309_s29  ;;  %348 = vst.msk [vmem:[#allocation3 + $0xa0] sm:$0xff] %vm215_vm1, %v2566_v40 }
  0x65   : > { %v2573_v42 = vld [vmem:[#allocation2 + $0xf8] sm:$0xff]  ;;  %237 = vst.msk [vmem:[#allocation2 + $0x111] sm:$0xff] %vm215_vm1, %v203_v39 }
  0x66   : > { %349 = vst.msk [vmem:[#allocation3 + $0xa8] sm:$0xff] %vm215_vm1, %v2573_v42 }
  0x67   : > { %233 = vst.msk [vmem:[#allocation2 + $0xe1] sm:$0xff] %vm215_vm1, %v199_v41  ;;  %v2795_v41 = vld [vmem:[#allocation2 + $0x31] sm:$0xff] }
  0x68   : > { %414 = vrot.lane.b32.xlu2 %v2560_v38, %s2309_s29  ;;  %v2583_v45 = vld [vmem:[#allocation2 + $0x120] sm:$0xff]  ;;  %240 = vst.msk [vmem:[#allocation2 + $0x139] sm:$0xff] %vm215_vm1, %v206_v43  ;;  %v2797_v43 = vld [vmem:[#allocation2 + $0x69] sm:$0xff] }
  0x69   : > { %424 = vrot.lane.b32.xlu1 %v2539_v33, %s2309_s29  ;;  %352 = vst.msk [vmem:[#allocation3 + $0xc0] sm:$0xff] %vm215_vm1, %v2583_v45  ;;  %v2592_v47 = vld [vmem:[#allocation2 + $0x108] sm:$0xff] }
  0x6a   : > { %241 = vst.msk [vmem:[#allocation2 + $0x141] sm:$0xff] %vm215_vm1, %v207_v44  ;;  %v2804_v44 = vld [vmem:[#allocation2 + $0x61] sm:$0xff] }
  0x6b   : > { %350 = vst.msk [vmem:[#allocation3 + $0xb0] sm:$0xff] %vm215_vm1, %v2592_v47 }
  0x6c   : > { %422 = vrot.lane.b32.xlu0 %v2544_v34, %s2309_s29  ;;  %v2599_v49 = vld [vmem:[#allocation2 + $0x110] sm:$0xff]  ;;  %244 = vst.msk [vmem:[#allocation2 + $0x169] sm:$0xff] %vm215_vm1, %v210_v46 }
  0x6d   : > { %351 = vst.msk [vmem:[#allocation3 + $0xb8] sm:$0xff] %vm215_vm1, %v2599_v49 }
  0x6e   : > { %v2604_v50 = vld [vmem:[#allocation2 + $0xe0] sm:$0xff]  ;;  %242 = vst.msk [vmem:[#allocation2 + $0x151] sm:$0xff] %vm215_vm1, %v208_v48 }
  0x6f   : > { %347 = vst.msk [vmem:[#allocation3 + $0x98] sm:$0xff] %vm215_vm1, %v2604_v50  ;;  %v2610_v52 = vld [vmem:[#allocation2 + $0x138] sm:$0xff] }
  0x70   : > { %420 = vrot.lane.b32.xlu2 %v2550_v36, %s2309_s29  ;;  %354 = vst.msk [vmem:[#allocation3 + $0xd0] sm:$0xff] %vm215_vm1, %v2610_v52 }
  0x71   : > { %430 = vrot.lane.b32.xlu1 %v2573_v42, %s2309_s29  ;;  %v2619_v54 = vld [vmem:[#allocation2 + $0x140] sm:$0xff]  ;;  %243 = vst.msk [vmem:[#allocation2 + $0x159] sm:$0xff] %vm215_vm1, %v209_v51 }
  0x72   : > { %355 = vst.msk [vmem:[#allocation3 + $0xd8] sm:$0xff] %vm215_vm1, %v2619_v54 }
  0x73   : > { %v2625_v56 = vld [vmem:[#allocation2 + $0x168] sm:$0xff]  ;;  %239 = vst.msk [vmem:[#allocation2 + $0x129] sm:$0xff] %vm215_vm1, %v205_v53  ;;  %v2825_v53 = vld [vmem:[#allocation2 + $0x79] sm:$0xff] }
  0x74   : > { %428 = vrot.lane.b32.xlu0 %v2566_v40, %s2309_s29  ;;  %358 = vst.msk [vmem:[#allocation3 + $0xf0] sm:$0xff] %vm215_vm1, %v2625_v56 }
  0x75   : > { %246 = vst.msk [vmem:[#allocation2 + $0x181] sm:$0xff] %vm215_vm1, %v212_v55  ;;  %v2636_v59 = vld [vmem:[#allocation2 + $0x150] sm:$0xff] }
  0x76   : > { %247 = vst.msk [vmem:[#allocation2 + $0x189] sm:$0xff] %vm215_vm1, %v213_v57  ;;  %v2827_v55 = vld [vmem:[#allocation2 + $0xb1] sm:$0xff] }
  0x77   : > { %356 = vst.msk [vmem:[#allocation3 + $0xe0] sm:$0xff] %vm215_vm1, %v2636_v59 }
  0x78   : > { %426 = vrot.lane.b32.xlu2 %v2604_v50, %s2309_s29  ;;  %v2642_v60 = vld [vmem:[#allocation2 + $0x158] sm:$0xff]  ;;  %245 = vst.msk [vmem:[#allocation2 + $0x171] sm:$0xff] %vm215_vm1, %v211_v58 }
  0x79   : > { %436 = vrot.lane.b32.xlu1 %v2583_v45, %s2309_s29  ;;  %357 = vst.msk [vmem:[#allocation3 + $0xe8] sm:$0xff] %vm215_vm1, %v2642_v60 }
  0x7a   : > { %v2649_v61 = vld [vmem:[#allocation2 + $0x128] sm:$0xff]  ;;  %328 = vst.msk [vmem:[#allocation3] sm:$0xff] %vm215_vm1, %v292_v3 }
  0x7b   : > { %353 = vst.msk [vmem:[#allocation3 + $0xc8] sm:$0xff] %vm215_vm1, %v2649_v61 }
  0x7c   : > { %434 = vrot.lane.b32.xlu0 %v2599_v49, %s2309_s29  ;;  %v2677_v0 = vld [vmem:[#allocation2 + $0x180] sm:$0xff]  ;;  %329 = vst.msk [vmem:[#allocation3 + $0x8] sm:$0xff] %vm215_vm1, %v293_v4 }
  0x7d   : > { %v2671_v63 = vld [vmem:[#allocation2 + $0x188] sm:$0xff]  ;;  %v2857_v4 = vld [vmem:[#allocation2 + $0xf9] sm:$0xff] }
  0x7f   : > { %v2655_v62 = vld [vmem:[#allocation2 + $0x170] sm:$0xff] }
  0x80   : > { %432 = vrot.lane.b32.xlu2 %v2592_v47, %s2309_s29  ;;  %359 = vst.msk [vmem:[#allocation3 + $0xf8] sm:$0xff] %vm215_vm1, %v2655_v62 }
  0x81   : > { %442 = vrot.lane.b32.xlu1 %v2619_v54, %s2309_s29 }
  0x84   : > { %440 = vrot.lane.b32.xlu0 %v2610_v52, %s2309_s29 }
  0x88   : > { %438 = vrot.lane.b32.xlu2 %v2649_v61, %s2309_s29 }
  0x89   : > { %448 = vrot.lane.b32.xlu1 %v2625_v56, %s2309_s29 }
  0x8c   : > { %446 = vrot.lane.b32.xlu0 %v2642_v60, %s2309_s29 }
  0x90   : > { %444 = vrot.lane.b32.xlu2 %v2636_v59, %s2309_s29 }
  0x91   : > { %454 = vrot.lane.b32.xlu1 %v2671_v63, %s2309_s29 }
  0x94   : > { %452 = vrot.lane.b32.xlu0 %v2677_v0, %s2309_s29  ;;  %v397_v1 = vpop.permute.xlu1 %396 }
  0x95   : > { %491 = vst.msk [vmem:[#allocation3 + $0x10] sm:$0xff] %vm488_vm2, %v397_v1  ;;  %v2855_v1 = vld [vmem:[#allocation2 + $0xc1] sm:$0xff] }
  0x98   : > { %450 = vrot.lane.b32.xlu2 %v2655_v62, %s2309_s29  ;;  %s2264_s29 = scalar_lea.hbm %s3780_s3, 8 }
  0x99   : > { %527 = vrot.lane.b32.xlu1 %v2483_v17, %s2310_s30 }
  0x9c   : > { %525 = vrot.lane.b32.xlu0 %v2464_v12, %s2310_s30 }
  0xa0   : > { %523 = vrot.lane.b32.xlu2 %v2411_v2, %s2310_s30 }
  0xa1   : > { %533 = vrot.lane.b32.xlu1 %v2478_v16, %s2310_s30 }
  0xa4   : > { %531 = vrot.lane.b32.xlu0 %v2473_v15, %s2310_s30 }
  0xa8   : > { %529 = vrot.lane.b32.xlu2 %v2516_v27, %s2310_s30  ;;  %v401_v5 = vpop.permute.xlu2 %400 }
  0xa9   : > { %539 = vrot.lane.b32.xlu1 %v2490_v19, %s2310_s30  ;;  %493 = vst.msk [vmem:[#allocation3 + $0x20] sm:$0xff] %vm488_vm2, %v401_v5  ;;  %v2864_v5 = vld [vmem:[#allocation2 + $0xf1] sm:$0xff] }
  0xac   : > { %537 = vrot.lane.b32.xlu0 %v2504_v24, %s2310_s30 }
  0xb0   : > { %535 = vrot.lane.b32.xlu2 %v2501_v22, %s2310_s30 }
  0xb1   : > { %545 = vrot.lane.b32.xlu1 %v2528_v30, %s2310_s30 }
  0xb2   : > { %v403_v2 = vpop.permute.xlu2 %402 }
  0xb3   : > { %494 = vst.msk [vmem:[#allocation3 + $0x28] sm:$0xff] %vm488_vm2, %v403_v2 }
  0xb4   : > { %543 = vrot.lane.b32.xlu0 %v2523_v28, %s2310_s30 }
  0xb6   : > { %v393_v6 = vpop.permute.xlu0 %392 }
  0xb7   : > { %489 = vst.msk [vmem:[#allocation3] sm:$0xff] %vm488_vm2, %v393_v6 }
  0xb8   : > { %541 = vrot.lane.b32.xlu2 %v2560_v38, %s2310_s30  ;;  %v2789_v38 = vld [vmem:[#allocation2 + $0x39] sm:$0xff] }
  0xb9   : > { %551 = vrot.lane.b32.xlu1 %v2539_v33, %s2310_s30 }
  0xba   : > { %v409_v7 = vpop.permute.xlu2 %408 }
  0xbb   : > { %v399_v8 = vpop.permute.xlu1 %398  ;;  %497 = vst.msk [vmem:[#allocation3 + $0x40] sm:$0xff] %vm488_vm2, %v409_v7  ;;  %v2870_v7 = vld [vmem:[#allocation2 + $0xe1] sm:$0xff] }
  0xbc   : > { %549 = vrot.lane.b32.xlu0 %v2544_v34, %s2310_s30  ;;  %492 = vst.msk [vmem:[#allocation3 + $0x18] sm:$0xff] %vm488_vm2, %v399_v8 }
  0xbe   : > { %v395_v9 = vpop.permute.xlu0 %394 }
  0xbf   : > { %490 = vst.msk [vmem:[#allocation3 + $0x8] sm:$0xff] %vm488_vm2, %v395_v9  ;;  %v2872_v9 = vld [vmem:[#allocation2 + $0x121] sm:$0xff] }
  0xc0   : > { %547 = vrot.lane.b32.xlu2 %v2550_v36, %s2310_s30 }
  0xc1   : > { %557 = vrot.lane.b32.xlu1 %v2573_v42, %s2310_s30 }
  0xc2   : > { %v415_v10 = vpop.permute.xlu2 %414 }
  0xc3   : > { %v407_v11 = vpop.permute.xlu1 %406  ;;  %500 = vst.msk [vmem:[#allocation3 + $0x58] sm:$0xff] %vm488_vm2, %v415_v10  ;;  %v2879_v10 = vld [vmem:[#allocation2 + $0x111] sm:$0xff] }
  0xc4   : > { %555 = vrot.lane.b32.xlu0 %v2566_v40, %s2310_s30  ;;  %496 = vst.msk [vmem:[#allocation3 + $0x38] sm:$0xff] %vm488_vm2, %v407_v11 }
  0xc6   : > { %v405_v12 = vpop.permute.xlu0 %404 }
  0xc7   : > { %495 = vst.msk [vmem:[#allocation3 + $0x30] sm:$0xff] %vm488_vm2, %v405_v12 }
  0xc8   : > { %553 = vrot.lane.b32.xlu2 %v2604_v50, %s2310_s30  ;;  %v2819_v50 = vld [vmem:[#allocation2 + $0x81] sm:$0xff] }
  0xc9   : > { %563 = vrot.lane.b32.xlu1 %v2583_v45, %s2310_s30 }
  0xca   : > { %v421_v13 = vpop.permute.xlu2 %420 }
  0xcb   : > { %v413_v14 = vpop.permute.xlu1 %412  ;;  %503 = vst.msk [vmem:[#allocation3 + $0x70] sm:$0xff] %vm488_vm2, %v421_v13  ;;  %v2885_v13 = vld [vmem:[#allocation2 + $0x109] sm:$0xff] }
  0xcc   : > { %561 = vrot.lane.b32.xlu0 %v2599_v49, %s2310_s30  ;;  %499 = vst.msk [vmem:[#allocation3 + $0x50] sm:$0xff] %vm488_vm2, %v413_v14  ;;  %v2812_v49 = vld [vmem:[#allocation2 + $0x91] sm:$0xff] }
  0xce   : > { %v411_v15 = vpop.permute.xlu0 %410 }
  0xcf   : > { %498 = vst.msk [vmem:[#allocation3 + $0x48] sm:$0xff] %vm488_vm2, %v411_v15  ;;  %v2887_v15 = vld [vmem:[#allocation2 + $0x141] sm:$0xff] }
  0xd0   : > { %559 = vrot.lane.b32.xlu2 %v2592_v47, %s2310_s30  ;;  %v2810_v47 = vld [vmem:[#allocation2 + $0x51] sm:$0xff] }
  0xd1   : > { %569 = vrot.lane.b32.xlu1 %v2619_v54, %s2310_s30 }
  0xd2   : > { %v427_v16 = vpop.permute.xlu2 %426 }
  0xd3   : > { %v419_v17 = vpop.permute.xlu1 %418  ;;  %506 = vst.msk [vmem:[#allocation3 + $0x88] sm:$0xff] %vm488_vm2, %v427_v16  ;;  %v2894_v16 = vld [vmem:[#allocation2 + $0x139] sm:$0xff] }
  0xd4   : > { %567 = vrot.lane.b32.xlu0 %v2610_v52, %s2310_s30  ;;  %502 = vst.msk [vmem:[#allocation3 + $0x68] sm:$0xff] %vm488_vm2, %v419_v17 }
  0xd6   : > { %v417_v18 = vpop.permute.xlu0 %416 }
  0xd7   : > { %501 = vst.msk [vmem:[#allocation3 + $0x60] sm:$0xff] %vm488_vm2, %v417_v18 }
  0xd8   : > { %565 = vrot.lane.b32.xlu2 %v2649_v61, %s2310_s30  ;;  %v2842_v61 = vld [vmem:[#allocation2 + $0xd9] sm:$0xff] }
  0xd9   : > { %575 = vrot.lane.b32.xlu1 %v2625_v56, %s2310_s30  ;;  %v2834_v56 = vld [vmem:[#allocation2 + $0xa9] sm:$0xff] }
  0xda   : > { %v433_v19 = vpop.permute.xlu2 %432 }
  0xdb   : > { %v425_v20 = vpop.permute.xlu1 %424  ;;  %509 = vst.msk [vmem:[#allocation3 + $0xa0] sm:$0xff] %vm488_vm2, %v433_v19  ;;  %v2900_v19 = vld [vmem:[#allocation2 + $0x129] sm:$0xff] }
  0xdc   : > { %573 = vrot.lane.b32.xlu0 %v2642_v60, %s2310_s30  ;;  %505 = vst.msk [vmem:[#allocation3 + $0x80] sm:$0xff] %vm488_vm2, %v425_v20 }
  0xde   : > { %v423_v21 = vpop.permute.xlu0 %422 }
  0xdf   : > { %504 = vst.msk [vmem:[#allocation3 + $0x78] sm:$0xff] %vm488_vm2, %v423_v21  ;;  %v2902_v21 = vld [vmem:[#allocation2 + $0x169] sm:$0xff] }
  0xe0   : > { %571 = vrot.lane.b32.xlu2 %v2636_v59, %s2310_s30  ;;  %v2840_v59 = vld [vmem:[#allocation2 + $0x99] sm:$0xff] }
  0xe1   : > { %581 = vrot.lane.b32.xlu1 %v2671_v63, %s2310_s30 }
  0xe2   : > { %v439_v22 = vpop.permute.xlu2 %438 }
  0xe3   : > { %v431_v23 = vpop.permute.xlu1 %430  ;;  %512 = vst.msk [vmem:[#allocation3 + $0xb8] sm:$0xff] %vm488_vm2, %v439_v22  ;;  %v2909_v22 = vld [vmem:[#allocation2 + $0x159] sm:$0xff] }
  0xe4   : > { %579 = vrot.lane.b32.xlu0 %v2677_v0, %s2310_s30  ;;  %508 = vst.msk [vmem:[#allocation3 + $0x98] sm:$0xff] %vm488_vm2, %v431_v23 }
  0xe6   : > { %v429_v24 = vpop.permute.xlu0 %428 }
  0xe7   : > { %507 = vst.msk [vmem:[#allocation3 + $0x90] sm:$0xff] %vm488_vm2, %v429_v24 }
  0xe8   : > { %577 = vrot.lane.b32.xlu2 %v2655_v62, %s2310_s30  ;;  %v2849_v62 = vld [vmem:[#allocation2 + $0xc9] sm:$0xff] }
  0xe9   : > { %720 = vrot.lane.b32.xlu1 %v652_v25, %s2311_s4  ;;  %v2915_v25 = vld [vmem:[#allocation2 + $0x151] sm:$0xff] }
  0xea   : > { %v445_v27 = vpop.permute.xlu2 %444 }
  0xeb   : > { %v437_v28 = vpop.permute.xlu1 %436  ;;  %515 = vst.msk [vmem:[#allocation3 + $0xd0] sm:$0xff] %vm488_vm2, %v445_v27 }
  0xec   : > { %585 = vrot.lane.b32.xlu0 %v327_v26, %s2310_s30  ;;  %511 = vst.msk [vmem:[#allocation3 + $0xb0] sm:$0xff] %vm488_vm2, %v437_v28 }
  0xee   : > { %v435_v30 = vpop.permute.xlu0 %434 }
  0xef   : > { %510 = vst.msk [vmem:[#allocation3 + $0xa8] sm:$0xff] %vm488_vm2, %v435_v30 }
  0xf0   : > { %583 = vrot.lane.b32.xlu2 %v326_v29, %s2310_s30  ;;  %v2926_v29 = vld [vmem:[#allocation2 + $0x171] sm:$0xff] }
  0xf1   : > { %726 = vrot.lane.b32.xlu1 %v2771_v31, %s2311_s4 }
  0xf2   : > { %v451_v33 = vpop.permute.xlu2 %450 }
  0xf3   : > { %v443_v34 = vpop.permute.xlu1 %442  ;;  %518 = vst.msk [vmem:[#allocation3 + $0xe8] sm:$0xff] %vm488_vm2, %v451_v33 }
  0xf4   : > { %724 = vrot.lane.b32.xlu0 %v2777_v32, %s2311_s4  ;;  %514 = vst.msk [vmem:[#allocation3 + $0xc8] sm:$0xff] %vm488_vm2, %v443_v34 }
  0xf6   : > { %v441_v36 = vpop.permute.xlu0 %440 }
  0xf7   : > { %513 = vst.msk [vmem:[#allocation3 + $0xc0] sm:$0xff] %vm488_vm2, %v441_v36 }
  0xf8   : > { %722 = vrot.lane.b32.xlu2 %v653_v35, %s2311_s4 }
  0xf9   : > { %732 = vrot.lane.b32.xlu1 %v2783_v37, %s2311_s4 }
  0xfa   : > { %v524_v39 = vpop.permute.xlu2 %523 }
  0xfb   : > { %v449_v40 = vpop.permute.xlu1 %448  ;;  %620 = vst.msk [vmem:[#allocation3] sm:$0xff] %vm619_vm3, %v524_v39 }
  0xfc   : > { %730 = vrot.lane.b32.xlu0 %v2789_v38, %s2311_s4  ;;  %517 = vst.msk [vmem:[#allocation3 + $0xe0] sm:$0xff] %vm488_vm2, %v449_v40 }
  0xfe   : > { %v447_v42 = vpop.permute.xlu0 %446 }
  0xff   : > { %516 = vst.msk [vmem:[#allocation3 + $0xd8] sm:$0xff] %vm488_vm2, %v447_v42 }
 0x100   : > { %728 = vrot.lane.b32.xlu2 %v2795_v41, %s2311_s4 }
 0x101   : > { %738 = vrot.lane.b32.xlu1 %v2797_v43, %s2311_s4 }
 0x102   : > { %v530_v45 = vpop.permute.xlu2 %529 }
 0x103   : > { %v455_v46 = vpop.permute.xlu1 %454  ;;  %623 = vst.msk [vmem:[#allocation3 + $0x18] sm:$0xff] %vm619_vm3, %v530_v45 }
 0x104   : > { %736 = vrot.lane.b32.xlu0 %v2804_v44, %s2311_s4  ;;  %520 = vst.msk [vmem:[#allocation3 + $0xf8] sm:$0xff] %vm488_vm2, %v455_v46 }
 0x106   : > { %v453_v48 = vpop.permute.xlu0 %452 }
 0x107   : > { %519 = vst.msk [vmem:[#allocation3 + $0xf0] sm:$0xff] %vm488_vm2, %v453_v48 }
 0x108   : > { %734 = vrot.lane.b32.xlu2 %v2810_v47, %s2311_s4 }
 0x109   : > { %744 = vrot.lane.b32.xlu1 %v2812_v49, %s2311_s4 }
 0x10a   : > { %v536_v51 = vpop.permute.xlu2 %535 }
 0x10b   : > { %v528_v52 = vpop.permute.xlu1 %527  ;;  %626 = vst.msk [vmem:[#allocation3 + $0x30] sm:$0xff] %vm619_vm3, %v536_v51 }
 0x10c   : > { %742 = vrot.lane.b32.xlu0 %v2819_v50, %s2311_s4  ;;  %622 = vst.msk [vmem:[#allocation3 + $0x10] sm:$0xff] %vm619_vm3, %v528_v52 }
 0x10e   : > { %v526_v54 = vpop.permute.xlu0 %525 }
 0x10f   : > { %621 = vst.msk [vmem:[#allocation3 + $0x8] sm:$0xff] %vm619_vm3, %v526_v54 }
 0x110   : > { %740 = vrot.lane.b32.xlu2 %v2825_v53, %s2311_s4 }
 0x111   : > { %750 = vrot.lane.b32.xlu1 %v2827_v55, %s2311_s4 }
 0x112   : > { %v542_v57 = vpop.permute.xlu2 %541 }
 0x113   : > { %v534_v58 = vpop.permute.xlu1 %533  ;;  %629 = vst.msk [vmem:[#allocation3 + $0x48] sm:$0xff] %vm619_vm3, %v542_v57 }
 0x114   : > { %748 = vrot.lane.b32.xlu0 %v2834_v56, %s2311_s4  ;;  %625 = vst.msk [vmem:[#allocation3 + $0x28] sm:$0xff] %vm619_vm3, %v534_v58 }
 0x116   : > { %v532_v60 = vpop.permute.xlu0 %531 }
 0x117   : > { %624 = vst.msk [vmem:[#allocation3 + $0x20] sm:$0xff] %vm619_vm3, %v532_v60 }
 0x118   : > { %746 = vrot.lane.b32.xlu2 %v2840_v59, %s2311_s4 }
 0x119   : > { %756 = vrot.lane.b32.xlu1 %v2842_v61, %s2311_s4 }
 0x11a   : > { %v548_v63 = vpop.permute.xlu2 %547 }
 0x11b   : > { %v540_v0 = vpop.permute.xlu1 %539  ;;  %632 = vst.msk [vmem:[#allocation3 + $0x60] sm:$0xff] %vm619_vm3, %v548_v63 }
 0x11c   : > { %754 = vrot.lane.b32.xlu0 %v2849_v62, %s2311_s4  ;;  %628 = vst.msk [vmem:[#allocation3 + $0x40] sm:$0xff] %vm619_vm3, %v540_v0 }
 0x11e   : > { %v538_v3 = vpop.permute.xlu0 %537 }
 0x11f   : > { %627 = vst.msk [vmem:[#allocation3 + $0x38] sm:$0xff] %vm619_vm3, %v538_v3 }
 0x120   : > { %752 = vrot.lane.b32.xlu2 %v2855_v1, %s2311_s4 }
 0x121   : > { %762 = vrot.lane.b32.xlu1 %v2857_v4, %s2311_s4 }
 0x122   : > { %v554_v2 = vpop.permute.xlu2 %553 }
 0x123   : > { %v546_v6 = vpop.permute.xlu1 %545  ;;  %635 = vst.msk [vmem:[#allocation3 + $0x78] sm:$0xff] %vm619_vm3, %v554_v2 }
 0x124   : > { %760 = vrot.lane.b32.xlu0 %v2864_v5, %s2311_s4  ;;  %631 = vst.msk [vmem:[#allocation3 + $0x58] sm:$0xff] %vm619_vm3, %v546_v6 }
 0x126   : > { %v544_v8 = vpop.permute.xlu0 %543 }
 0x127   : > { %630 = vst.msk [vmem:[#allocation3 + $0x50] sm:$0xff] %vm619_vm3, %v544_v8 }
 0x128   : > { %758 = vrot.lane.b32.xlu2 %v2870_v7, %s2311_s4 }
 0x129   : > { %768 = vrot.lane.b32.xlu1 %v2872_v9, %s2311_s4 }
 0x12a   : > { %v560_v11 = vpop.permute.xlu2 %559 }
 0x12b   : > { %v552_v12 = vpop.permute.xlu1 %551  ;;  %638 = vst.msk [vmem:[#allocation3 + $0x90] sm:$0xff] %vm619_vm3, %v560_v11 }
 0x12c   : > { %766 = vrot.lane.b32.xlu0 %v2879_v10, %s2311_s4  ;;  %634 = vst.msk [vmem:[#allocation3 + $0x70] sm:$0xff] %vm619_vm3, %v552_v12 }
 0x12e   : > { %v550_v14 = vpop.permute.xlu0 %549 }
 0x12f   : > { %633 = vst.msk [vmem:[#allocation3 + $0x68] sm:$0xff] %vm619_vm3, %v550_v14 }
 0x130   : > { %764 = vrot.lane.b32.xlu2 %v2885_v13, %s2311_s4 }
 0x131   : > { %774 = vrot.lane.b32.xlu1 %v2887_v15, %s2311_s4 }
 0x132   : > { %v566_v17 = vpop.permute.xlu2 %565 }
 0x133   : > { %v558_v18 = vpop.permute.xlu1 %557  ;;  %641 = vst.msk [vmem:[#allocation3 + $0xa8] sm:$0xff] %vm619_vm3, %v566_v17  ;;  %v3009_v17 = vld [vmem:[#allocation2 + $0x189] sm:$0xff] }
 0x134   : > { %772 = vrot.lane.b32.xlu0 %v2894_v16, %s2311_s4  ;;  %637 = vst.msk [vmem:[#allocation3 + $0x88] sm:$0xff] %vm619_vm3, %v558_v18  ;;  %v3016_v18 = vld [vmem:[#allocation2 + $0x181] sm:$0xff] }
 0x136   : > { %v556_v20 = vpop.permute.xlu0 %555 }
 0x137   : > { %636 = vst.msk [vmem:[#allocation3 + $0x80] sm:$0xff] %vm619_vm3, %v556_v20 }
 0x138   : > { %770 = vrot.lane.b32.xlu2 %v2900_v19, %s2311_s4 }
 0x139   : > { %780 = vrot.lane.b32.xlu1 %v2902_v21, %s2311_s4 }
 0x13a   : > { %v572_v23 = vpop.permute.xlu2 %571 }
 0x13b   : > { %v564_v24 = vpop.permute.xlu1 %563  ;;  %644 = vst.msk [vmem:[#allocation3 + $0xc0] sm:$0xff] %vm619_vm3, %v572_v23 }
 0x13c   : > { %778 = vrot.lane.b32.xlu0 %v2909_v22, %s2311_s4  ;;  %640 = vst.msk [vmem:[#allocation3 + $0xa0] sm:$0xff] %vm619_vm3, %v564_v24 }
 0x13e   : > { %v562_v26 = vpop.permute.xlu0 %561 }
 0x13f   : > { %639 = vst.msk [vmem:[#allocation3 + $0x98] sm:$0xff] %vm619_vm3, %v562_v26 }
 0x140   : > { %776 = vrot.lane.b32.xlu2 %v2915_v25, %s2311_s4 }
 0x141   : > { %853 = vrot.lane.b32.xlu1 %v2771_v31, %s2312_s5 }
 0x142   : > { %v578_v27 = vpop.permute.xlu2 %577 }
 0x143   : > { %v570_v28 = vpop.permute.xlu1 %569  ;;  %647 = vst.msk [vmem:[#allocation3 + $0xd8] sm:$0xff] %vm619_vm3, %v578_v27 }
 0x144   : > { %851 = vrot.lane.b32.xlu0 %v2777_v32, %s2312_s5  ;;  %643 = vst.msk [vmem:[#allocation3 + $0xb8] sm:$0xff] %vm619_vm3, %v570_v28 }
 0x146   : > { %v568_v30 = vpop.permute.xlu0 %567 }
 0x147   : > { %642 = vst.msk [vmem:[#allocation3 + $0xb0] sm:$0xff] %vm619_vm3, %v568_v30 }
 0x148   : > { %782 = vrot.lane.b32.xlu2 %v2926_v29, %s2311_s4 }
 0x149   : > { %859 = vrot.lane.b32.xlu1 %v2783_v37, %s2312_s5 }
 0x14a   : > { %v584_v31 = vpop.permute.xlu2 %583 }
 0x14b   : > { %v576_v33 = vpop.permute.xlu1 %575  ;;  %650 = vst.msk [vmem:[#allocation3 + $0xf0] sm:$0xff] %vm619_vm3, %v584_v31  ;;  %v1111_v31 = vld [vmem:[#allocation2 + $0x2] sm:$0xff] }
 0x14c   : > { %857 = vrot.lane.b32.xlu0 %v2789_v38, %s2312_s5  ;;  %646 = vst.msk [vmem:[#allocation3 + $0xd0] sm:$0xff] %vm619_vm3, %v576_v33  ;;  %v1112_v33 = vld [vmem:[#allocation2 + $0xa] sm:$0xff] }
 0x14e   : > { %v574_v32 = vpop.permute.xlu0 %573 }
 0x14f   : > { %645 = vst.msk [vmem:[#allocation3 + $0xc8] sm:$0xff] %vm619_vm3, %v574_v32 }
 0x150   : > { %855 = vrot.lane.b32.xlu2 %v2795_v41, %s2312_s5 }
 0x151   : > { %865 = vrot.lane.b32.xlu1 %v2797_v43, %s2312_s5 }
 0x152   : > { %v723_v34 = vpop.permute.xlu2 %722 }
 0x153   : > { %v582_v35 = vpop.permute.xlu1 %581  ;;  %818 = vst.msk [vmem:[#allocation3 + $0x8] sm:$0xff] %vm816_vm4, %v723_v34 }
 0x154   : > { %863 = vrot.lane.b32.xlu0 %v2804_v44, %s2312_s5  ;;  %649 = vst.msk [vmem:[#allocation3 + $0xe8] sm:$0xff] %vm619_vm3, %v582_v35 }
 0x156   : > { %v580_v36 = vpop.permute.xlu0 %579 }
 0x157   : > { %648 = vst.msk [vmem:[#allocation3 + $0xe0] sm:$0xff] %vm619_vm3, %v580_v36  ;;  %v1113_v36 = vld [vmem:[#allocation2 + $0x1a] sm:$0xff] }
 0x158   : > { %861 = vrot.lane.b32.xlu2 %v2810_v47, %s2312_s5 }
 0x159   : > { %871 = vrot.lane.b32.xlu1 %v2812_v49, %s2312_s5 }
 0x15a   : > { %v729_v39 = vpop.permute.xlu2 %728 }
 0x15b   : > { %v721_v40 = vpop.permute.xlu1 %720  ;;  %821 = vst.msk [vmem:[#allocation3 + $0x20] sm:$0xff] %vm816_vm4, %v729_v39 }
 0x15c   : > { %869 = vrot.lane.b32.xlu0 %v2819_v50, %s2312_s5  ;;  %817 = vst.msk [vmem:[#allocation3] sm:$0xff] %vm816_vm4, %v721_v40 }
 0x15e   : > { %v586_v42 = vpop.permute.xlu0 %585 }
 0x15f   : > { %651 = vst.msk [vmem:[#allocation3 + $0xf8] sm:$0xff] %vm619_vm3, %v586_v42  ;;  %v1114_v42 = vld [vmem:[#allocation2 + $0x22] sm:$0xff] }
 0x160   : > { %867 = vrot.lane.b32.xlu2 %v2825_v53, %s2312_s5 }
 0x161   : > { %877 = vrot.lane.b32.xlu1 %v2827_v55, %s2312_s5 }
 0x162   : > { %v735_v45 = vpop.permute.xlu2 %734 }
 0x163   : > { %v727_v46 = vpop.permute.xlu1 %726  ;;  %824 = vst.msk [vmem:[#allocation3 + $0x38] sm:$0xff] %vm816_vm4, %v735_v45 }
 0x164   : > { %875 = vrot.lane.b32.xlu0 %v2834_v56, %s2312_s5  ;;  %820 = vst.msk [vmem:[#allocation3 + $0x18] sm:$0xff] %vm816_vm4, %v727_v46  ;;  %v3130_v46 = vld [vmem:[#allocation2 + $0x7a] sm:$0xff] }
 0x166   : > { %v725_v48 = vpop.permute.xlu0 %724 }
 0x167   : > { %819 = vst.msk [vmem:[#allocation3 + $0x10] sm:$0xff] %vm816_vm4, %v725_v48 }
 0x168   : > { %873 = vrot.lane.b32.xlu2 %v2840_v59, %s2312_s5 }
 0x169   : > { %883 = vrot.lane.b32.xlu1 %v2842_v61, %s2312_s5 }
 0x16a   : > { %v741_v51 = vpop.permute.xlu2 %740 }
 0x16b   : > { %v733_v52 = vpop.permute.xlu1 %732  ;;  %827 = vst.msk [vmem:[#allocation3 + $0x50] sm:$0xff] %vm816_vm4, %v741_v51 }
 0x16c   : > { %881 = vrot.lane.b32.xlu0 %v2849_v62, %s2312_s5  ;;  %823 = vst.msk [vmem:[#allocation3 + $0x30] sm:$0xff] %vm816_vm4, %v733_v52  ;;  %v3140_v52 = vld [vmem:[#allocation2 + $0x62] sm:$0xff] }
 0x16e   : > { %v731_v54 = vpop.permute.xlu0 %730 }
 0x16f   : > { %822 = vst.msk [vmem:[#allocation3 + $0x28] sm:$0xff] %vm816_vm4, %v731_v54 }
 0x170   : > { %879 = vrot.lane.b32.xlu2 %v2855_v1, %s2312_s5 }
 0x171   : > { %889 = vrot.lane.b32.xlu1 %v2857_v4, %s2312_s5 }
 0x172   : > { %v747_v57 = vpop.permute.xlu2 %746 }
 0x173   : > { %v739_v58 = vpop.permute.xlu1 %738  ;;  %830 = vst.msk [vmem:[#allocation3 + $0x68] sm:$0xff] %vm816_vm4, %v747_v57  ;;  %v3146_v57 = vld [vmem:[#allocation2 + $0x92] sm:$0xff] }
 0x174   : > { %887 = vrot.lane.b32.xlu0 %v2864_v5, %s2312_s5  ;;  %826 = vst.msk [vmem:[#allocation3 + $0x48] sm:$0xff] %vm816_vm4, %v739_v58 }
 0x176   : > { %v737_v60 = vpop.permute.xlu0 %736 }
 0x177   : > { %825 = vst.msk [vmem:[#allocation3 + $0x40] sm:$0xff] %vm816_vm4, %v737_v60 }
 0x178   : > { %885 = vrot.lane.b32.xlu2 %v2870_v7, %s2312_s5 }
 0x179   : > { %895 = vrot.lane.b32.xlu1 %v2872_v9, %s2312_s5 }
 0x17a   : > { %v753_v63 = vpop.permute.xlu2 %752 }
 0x17b   : > { %v745_v0 = vpop.permute.xlu1 %744  ;;  %833 = vst.msk [vmem:[#allocation3 + $0x80] sm:$0xff] %vm816_vm4, %v753_v63  ;;  %v3152_v63 = vld [vmem:[#allocation2 + $0x4a] sm:$0xff] }
 0x17c   : > { %893 = vrot.lane.b32.xlu0 %v2879_v10, %s2312_s5  ;;  %829 = vst.msk [vmem:[#allocation3 + $0x60] sm:$0xff] %vm816_vm4, %v745_v0 }
 0x17e   : > { %v743_v3 = vpop.permute.xlu0 %742 }
 0x17f   : > { %828 = vst.msk [vmem:[#allocation3 + $0x58] sm:$0xff] %vm816_vm4, %v743_v3  ;;  %v3154_v3 = vld [vmem:[#allocation2 + $0x82] sm:$0xff] }
 0x180   : > { %891 = vrot.lane.b32.xlu2 %v2885_v13, %s2312_s5 }
 0x181   : > { %901 = vrot.lane.b32.xlu1 %v2887_v15, %s2312_s5 }
 0x182   : > { %v759_v2 = vpop.permute.xlu2 %758 }
 0x183   : > { %v751_v6 = vpop.permute.xlu1 %750  ;;  %836 = vst.msk [vmem:[#allocation3 + $0x98] sm:$0xff] %vm816_vm4, %v759_v2 }
 0x184   : > { %899 = vrot.lane.b32.xlu0 %v2894_v16, %s2312_s5  ;;  %832 = vst.msk [vmem:[#allocation3 + $0x78] sm:$0xff] %vm816_vm4, %v751_v6 }
 0x186   : > { %v749_v8 = vpop.permute.xlu0 %748 }
 0x187   : > { %831 = vst.msk [vmem:[#allocation3 + $0x70] sm:$0xff] %vm816_vm4, %v749_v8  ;;  %v3165_v8 = vld [vmem:[#allocation2 + $0x6a] sm:$0xff] }
 0x188   : > { %897 = vrot.lane.b32.xlu2 %v2900_v19, %s2312_s5 }
 0x189   : > { %907 = vrot.lane.b32.xlu1 %v2902_v21, %s2312_s5 }
 0x18a   : > { %v765_v11 = vpop.permute.xlu2 %764 }
 0x18b   : > { %v757_v12 = vpop.permute.xlu1 %756  ;;  %839 = vst.msk [vmem:[#allocation3 + $0xb0] sm:$0xff] %vm816_vm4, %v765_v11 }
 0x18c   : > { %905 = vrot.lane.b32.xlu0 %v2909_v22, %s2312_s5  ;;  %835 = vst.msk [vmem:[#allocation3 + $0x90] sm:$0xff] %vm816_vm4, %v757_v12  ;;  %v3167_v12 = vld [vmem:[#allocation2 + $0x9a] sm:$0xff] }
 0x18e   : > { %v755_v14 = vpop.permute.xlu0 %754 }
 0x18f   : > { %834 = vst.msk [vmem:[#allocation3 + $0x88] sm:$0xff] %vm816_vm4, %v755_v14  ;;  %v3174_v14 = vld [vmem:[#allocation2 + $0x52] sm:$0xff] }
 0x190   : > { %903 = vrot.lane.b32.xlu2 %v2915_v25, %s2312_s5 }
 0x191   : > { %913 = vrot.lane.b32.xlu1 %v3009_v17, %s2312_s5 }
 0x192   : > { %v771_v20 = vpop.permute.xlu2 %770 }
 0x193   : > { %v763_v23 = vpop.permute.xlu1 %762  ;;  %842 = vst.msk [vmem:[#allocation3 + $0xc8] sm:$0xff] %vm816_vm4, %v771_v20 }
 0x194   : > { %911 = vrot.lane.b32.xlu0 %v3016_v18, %s2312_s5  ;;  %838 = vst.msk [vmem:[#allocation3 + $0xa8] sm:$0xff] %vm816_vm4, %v763_v23  ;;  %v3180_v23 = vld [vmem:[#allocation2 + $0xc2] sm:$0xff] }
 0x196   : > { %v761_v24 = vpop.permute.xlu0 %760 }
 0x197   : > { %837 = vst.msk [vmem:[#allocation3 + $0xa0] sm:$0xff] %vm816_vm4, %v761_v24 }
 0x198   : > { %909 = vrot.lane.b32.xlu2 %v2926_v29, %s2312_s5 }
 0x199   : > { %986 = vrot.lane.b32.xlu1 %v2783_v37, %s2313_s6 }
 0x19a   : > { %v777_v26 = vpop.permute.xlu2 %776 }
 0x19b   : > { %v769_v27 = vpop.permute.xlu1 %768  ;;  %845 = vst.msk [vmem:[#allocation3 + $0xe0] sm:$0xff] %vm816_vm4, %v777_v26  ;;  %v3187_v26 = vld [vmem:[#allocation2 + $0xf2] sm:$0xff] }
 0x19c   : > { %984 = vrot.lane.b32.xlu0 %v2789_v38, %s2313_s6  ;;  %841 = vst.msk [vmem:[#allocation3 + $0xc0] sm:$0xff] %vm816_vm4, %v769_v27 }
 0x19e   : > { %v767_v28 = vpop.permute.xlu0 %766 }
 0x19f   : > { %840 = vst.msk [vmem:[#allocation3 + $0xb8] sm:$0xff] %vm816_vm4, %v767_v28 }
 0x1a0   : > { %982 = vrot.lane.b32.xlu2 %v2795_v41, %s2313_s6 }
 0x1a1   : > { %992 = vrot.lane.b32.xlu1 %v2797_v43, %s2313_s6 }
 0x1a2   : > { %v783_v30 = vpop.permute.xlu2 %782 }
 0x1a3   : > { %v775_v37 = vpop.permute.xlu1 %774  ;;  %848 = vst.msk [vmem:[#allocation3 + $0xf8] sm:$0xff] %vm816_vm4, %v783_v30  ;;  %v3193_v30 = vld [vmem:[#allocation2 + $0xda] sm:$0xff] }
 0x1a4   : > { %990 = vrot.lane.b32.xlu0 %v2804_v44, %s2313_s6  ;;  %844 = vst.msk [vmem:[#allocation3 + $0xd8] sm:$0xff] %vm816_vm4, %v775_v37 }
 0x1a6   : > { %v773_v38 = vpop.permute.xlu0 %772 }
 0x1a7   : > { %843 = vst.msk [vmem:[#allocation3 + $0xd0] sm:$0xff] %vm816_vm4, %v773_v38 }
 0x1a8   : > { %988 = vrot.lane.b32.xlu2 %v2810_v47, %s2313_s6 }
 0x1a9   : > { %998 = vrot.lane.b32.xlu1 %v2812_v49, %s2313_s6 }
 0x1aa   : > { %v856_v41 = vpop.permute.xlu2 %855 }
 0x1ab   : > { %v781_v43 = vpop.permute.xlu1 %780  ;;  %950 = vst.msk [vmem:[#allocation3 + $0x10] sm:$0xff] %vm947_vm5, %v856_v41 }
 0x1ac   : > { %996 = vrot.lane.b32.xlu0 %v2819_v50, %s2313_s6  ;;  %847 = vst.msk [vmem:[#allocation3 + $0xf0] sm:$0xff] %vm816_vm4, %v781_v43 }
 0x1ae   : > { %v779_v44 = vpop.permute.xlu0 %778 }
 0x1af   : > { %846 = vst.msk [vmem:[#allocation3 + $0xe8] sm:$0xff] %vm816_vm4, %v779_v44  ;;  %v3204_v44 = vld [vmem:[#allocation2 + $0xaa] sm:$0xff] }
 0x1b0   : > { %994 = vrot.lane.b32.xlu2 %v2825_v53, %s2313_s6 }
 0x1b1   : > { %1004 = vrot.lane.b32.xlu1 %v2827_v55, %s2313_s6 }
 0x1b2   : > { %v862_v47 = vpop.permute.xlu2 %861 }
 0x1b3   : > { %v854_v49 = vpop.permute.xlu1 %853  ;;  %953 = vst.msk [vmem:[#allocation3 + $0x28] sm:$0xff] %vm947_vm5, %v862_v47 }
 0x1b4   : > { %1002 = vrot.lane.b32.xlu0 %v2834_v56, %s2313_s6  ;;  %949 = vst.msk [vmem:[#allocation3 + $0x8] sm:$0xff] %vm947_vm5, %v854_v49 }
 0x1b6   : > { %v852_v50 = vpop.permute.xlu0 %851 }
 0x1b7   : > { %948 = vst.msk [vmem:[#allocation3] sm:$0xff] %vm947_vm5, %v852_v50  ;;  %v3215_v50 = vld [vmem:[#allocation2 + $0xca] sm:$0xff] }
 0x1b8   : > { %1000 = vrot.lane.b32.xlu2 %v2840_v59, %s2313_s6 }
 0x1b9   : > { %1010 = vrot.lane.b32.xlu1 %v2842_v61, %s2313_s6 }
 0x1ba   : > { %v868_v53 = vpop.permute.xlu2 %867 }
 0x1bb   : > { %v860_v55 = vpop.permute.xlu1 %859  ;;  %956 = vst.msk [vmem:[#allocation3 + $0x40] sm:$0xff] %vm947_vm5, %v868_v53 }
 0x1bc   : > { %1008 = vrot.lane.b32.xlu0 %v2849_v62, %s2313_s6  ;;  %952 = vst.msk [vmem:[#allocation3 + $0x20] sm:$0xff] %vm947_vm5, %v860_v55  ;;  %v3222_v55 = vld [vmem:[#allocation2 + $0xfa] sm:$0xff] }
 0x1be   : > { %v858_v56 = vpop.permute.xlu0 %857 }
 0x1bf   : > { %951 = vst.msk [vmem:[#allocation3 + $0x18] sm:$0xff] %vm947_vm5, %v858_v56 }
 0x1c0   : > { %1006 = vrot.lane.b32.xlu2 %v2855_v1, %s2313_s6 }
 0x1c1   : > { %1016 = vrot.lane.b32.xlu1 %v2857_v4, %s2313_s6 }
 0x1c2   : > { %v874_v59 = vpop.permute.xlu2 %873 }
 0x1c3   : > { %v866_v61 = vpop.permute.xlu1 %865  ;;  %959 = vst.msk [vmem:[#allocation3 + $0x58] sm:$0xff] %vm947_vm5, %v874_v59 }
 0x1c4   : > { %1014 = vrot.lane.b32.xlu0 %v2864_v5, %s2313_s6  ;;  %955 = vst.msk [vmem:[#allocation3 + $0x38] sm:$0xff] %vm947_vm5, %v866_v61  ;;  %v3228_v61 = vld [vmem:[#allocation2 + $0xe2] sm:$0xff] }
 0x1c6   : > { %v864_v62 = vpop.permute.xlu0 %863 }
 0x1c7   : > { %954 = vst.msk [vmem:[#allocation3 + $0x30] sm:$0xff] %vm947_vm5, %v864_v62 }
 0x1c8   : > { %1012 = vrot.lane.b32.xlu2 %v2870_v7, %s2313_s6 }
 0x1c9   : > { %1022 = vrot.lane.b32.xlu1 %v2872_v9, %s2313_s6 }
 0x1ca   : > { %v880_v1 = vpop.permute.xlu2 %879 }
 0x1cb   : > { %v872_v4 = vpop.permute.xlu1 %871  ;;  %962 = vst.msk [vmem:[#allocation3 + $0x70] sm:$0xff] %vm947_vm5, %v880_v1 }
 0x1cc   : > { %1020 = vrot.lane.b32.xlu0 %v2879_v10, %s2313_s6  ;;  %958 = vst.msk [vmem:[#allocation3 + $0x50] sm:$0xff] %vm947_vm5, %v872_v4 }
 0x1ce   : > { %v870_v5 = vpop.permute.xlu0 %869 }
 0x1cf   : > { %957 = vst.msk [vmem:[#allocation3 + $0x48] sm:$0xff] %vm947_vm5, %v870_v5  ;;  %v1606_v5 = vld [vmem:[%s3778_s1 + $0x20] sm:$0xf] }
 0x1d0   : > { %1018 = vrot.lane.b32.xlu2 %v2885_v13, %s2313_s6  ;;  %2142 = vmatpush.msk.msra.mxu0 %vm1704_vm7, %v1606_v5 }
 0x1d1   : > { %1028 = vrot.lane.b32.xlu1 %v2887_v15, %s2313_s6  ;;  %2181 = vmatpush.msk.msra.mxu1 %vm1704_vm7, %v1606_v5 }
 0x1d2   : > { %v886_v7 = vpop.permute.xlu2 %885  ;;  %2182 = vmatpush.msk.msra.mxu2 %vm1704_vm7, %v1606_v5  ;;  %2183 = vmatpush.msk.msra.mxu3 %vm1704_vm7, %v1606_v5 }
 0x1d3   : > { %v878_v9 = vpop.permute.xlu1 %877  ;;  %965 = vst.msk [vmem:[#allocation3 + $0x88] sm:$0xff] %vm947_vm5, %v886_v7 }
 0x1d4   : > { %1026 = vrot.lane.b32.xlu0 %v2894_v16, %s2313_s6  ;;  %961 = vst.msk [vmem:[#allocation3 + $0x68] sm:$0xff] %vm947_vm5, %v878_v9  ;;  %v1605_v9 = vld [vmem:[%s3778_s1 + $0x18] sm:$0xff] }
 0x1d5   : > { %1720 = vmatpush.msra.mxu0 %v1605_v9  ;;  %2184 = vmatpush.msra.mxu1 %v1605_v9 }
 0x1d6   : > { %v876_v10 = vpop.permute.xlu0 %875  ;;  %2185 = vmatpush.msra.mxu2 %v1605_v9  ;;  %2186 = vmatpush.msra.mxu3 %v1605_v9 }
 0x1d7   : > { %960 = vst.msk [vmem:[#allocation3 + $0x60] sm:$0xff] %vm947_vm5, %v876_v10  ;;  %v1604_v10 = vld [vmem:[%s3778_s1 + $0x10] sm:$0xff] }
 0x1d8   : > { %1024 = vrot.lane.b32.xlu2 %v2900_v19, %s2313_s6  ;;  %1721 = vmatpush.msra.mxu0 %v1604_v10 }
 0x1d9   : > { %1034 = vrot.lane.b32.xlu1 %v2902_v21, %s2313_s6  ;;  %2187 = vmatpush.msra.mxu1 %v1604_v10 }
 0x1da   : > { %v892_v13 = vpop.permute.xlu2 %891  ;;  %2188 = vmatpush.msra.mxu2 %v1604_v10  ;;  %2189 = vmatpush.msra.mxu3 %v1604_v10 }
 0x1db   : > { %v884_v15 = vpop.permute.xlu1 %883  ;;  %968 = vst.msk [vmem:[#allocation3 + $0xa0] sm:$0xff] %vm947_vm5, %v892_v13  ;;  %v3253_v13 = vld [vmem:[#allocation2 + $0x122] sm:$0xff] }
 0x1dc   : > { %1032 = vrot.lane.b32.xlu0 %v2909_v22, %s2313_s6  ;;  %964 = vst.msk [vmem:[#allocation3 + $0x80] sm:$0xff] %vm947_vm5, %v884_v15  ;;  %v1603_v15 = vld [vmem:[%s3778_s1 + $0x8] sm:$0xff] }
 0x1dd   : > { %1722 = vmatpush.msra.mxu0 %v1603_v15  ;;  %2190 = vmatpush.msra.mxu1 %v1603_v15 }
 0x1de   : > { %v882_v16 = vpop.permute.xlu0 %881  ;;  %2191 = vmatpush.msra.mxu2 %v1603_v15  ;;  %2192 = vmatpush.msra.mxu3 %v1603_v15 }
 0x1df   : > { %963 = vst.msk [vmem:[#allocation3 + $0x78] sm:$0xff] %vm947_vm5, %v882_v16 }
 0x1e0   : > { %1030 = vrot.lane.b32.xlu2 %v2915_v25, %s2313_s6  ;;  %v3115_v25 = vld [vmem:[#allocation2 + $0x32] sm:$0xff] }
 0x1e1   : > { %1179 = vrot.lane.b32.xlu1 %v1111_v31, %s2314_s7 }
 0x1e2   : > { %v898_v19 = vpop.permute.xlu2 %897 }
 0x1e3   : > { %v890_v21 = vpop.permute.xlu1 %889  ;;  %971 = vst.msk [vmem:[#allocation3 + $0xb8] sm:$0xff] %vm947_vm5, %v898_v19  ;;  %v1602_v19 = vld [vmem:[%s3778_s1] sm:$0xff] }
 0x1e4   : > { %1038 = vrot.lane.b32.xlu0 %v3016_v18, %s2313_s6  ;;  %967 = vst.msk [vmem:[#allocation3 + $0x98] sm:$0xff] %vm947_vm5, %v890_v21  ;;  %1723 = vmatpush.msra.mxu0 %v1602_v19 }
 0x1e5   : > { %2193 = vmatpush.msra.mxu1 %v1602_v19  ;;  %2194 = vmatpush.msra.mxu2 %v1602_v19 }
 0x1e6   : > { %v888_v22 = vpop.permute.xlu0 %887  ;;  %2195 = vmatpush.msra.mxu3 %v1602_v19 }
 0x1e7   : > { %966 = vst.msk [vmem:[#allocation3 + $0x90] sm:$0xff] %vm947_vm5, %v888_v22  ;;  %v3265_v22 = vld [vmem:[#allocation2 + $0x13a] sm:$0xff] }
 0x1e8   : > { %1036 = vrot.lane.b32.xlu2 %v2926_v29, %s2313_s6  ;;  %v3124_v29 = vld [vmem:[#allocation2 + $0x3a] sm:$0xff] }
 0x1e9   : > { %1181 = vrot.lane.b32.xlu1 %v1112_v33, %s2314_s7 }
 0x1ea   : > { %v904_v32 = vpop.permute.xlu2 %903 }
 0x1eb   : > { %v896_v34 = vpop.permute.xlu1 %895  ;;  %974 = vst.msk [vmem:[#allocation3 + $0xd0] sm:$0xff] %vm947_vm5, %v904_v32  ;;  %v3275_v32 = vld [vmem:[#allocation2 + $0xb2] sm:$0xff] }
 0x1ec   : > { %1441 = vrot.lane.b32.xlu0 %v3115_v25, %s2315_s8  ;;  %970 = vst.msk [vmem:[#allocation3 + $0xb0] sm:$0xff] %vm947_vm5, %v896_v34 }
 0x1ee   : > { %v894_v35 = vpop.permute.xlu0 %893 }
 0x1ef   : > { %969 = vst.msk [vmem:[#allocation3 + $0xa8] sm:$0xff] %vm947_vm5, %v894_v35  ;;  %v3282_v35 = vld [vmem:[#allocation2 + $0x152] sm:$0xff] }
 0x1f0   : > { %1310 = vrot.lane.b32.xlu2 %v1113_v36, %s2316_s9 }
 0x1f1   : > { %1183 = vrot.lane.b32.xlu1 %v1113_v36, %s2314_s7 }
 0x1f2   : > { %v910_v39 = vpop.permute.xlu2 %909 }
 0x1f3   : > { %v902_v40 = vpop.permute.xlu1 %901  ;;  %977 = vst.msk [vmem:[#allocation3 + $0xe8] sm:$0xff] %vm947_vm5, %v910_v39  ;;  %v3287_v39 = vld [vmem:[#allocation2 + $0x10a] sm:$0xff] }
 0x1f4   : > { %1443 = vrot.lane.b32.xlu0 %v3124_v29, %s2315_s8  ;;  %973 = vst.msk [vmem:[#allocation3 + $0xc8] sm:$0xff] %vm947_vm5, %v902_v40 }
 0x1f6   : > { %v900_v45 = vpop.permute.xlu0 %899 }
 0x1f7   : > { %972 = vst.msk [vmem:[#allocation3 + $0xc0] sm:$0xff] %vm947_vm5, %v900_v45 }
 0x1f8   : > { %1312 = vrot.lane.b32.xlu2 %v1114_v42, %s2316_s9 }
 0x1f9   : > { %1326 = vrot.lane.b32.xlu1 %v3130_v46, %s2316_s9 }
 0x1fa   : > { %v983_v48 = vpop.permute.xlu2 %982 }
 0x1fb   : > { %v908_v51 = vpop.permute.xlu1 %907  ;;  %1079 = vst.msk [vmem:[#allocation3] sm:$0xff] %vm1078_vm6, %v983_v48 }
 0x1fc   : > { %1314 = vrot.lane.b32.xlu0 %v3115_v25, %s2316_s9  ;;  %976 = vst.msk [vmem:[#allocation3 + $0xe0] sm:$0xff] %vm947_vm5, %v908_v51  ;;  %v3305_v51 = vld [vmem:[#allocation2 + $0x12a] sm:$0xff] }
 0x1fe   : > { %v906_v54 = vpop.permute.xlu0 %905 }
 0x1ff   : > { %975 = vst.msk [vmem:[#allocation3 + $0xd8] sm:$0xff] %vm947_vm5, %v906_v54 }
 0x200   : > { %1195 = vrot.lane.b32.xlu2 %v3140_v52, %s2314_s7 }
 0x201   : > { %1185 = vrot.lane.b32.xlu1 %v1114_v42, %s2314_s7 }
 0x202   : > { %v989_v58 = vpop.permute.xlu2 %988 }
 0x203   : > { %v914_v60 = vpop.permute.xlu1 %913  ;;  %1082 = vst.msk [vmem:[#allocation3 + $0x18] sm:$0xff] %vm1078_vm6, %v989_v58 }
 0x204   : > { %1457 = vrot.lane.b32.xlu0 %v3146_v57, %s2315_s8  ;;  %979 = vst.msk [vmem:[#allocation3 + $0xf8] sm:$0xff] %vm947_vm5, %v914_v60 }
 0x206   : > { %v912_v0 = vpop.permute.xlu0 %911 }
 0x207   : > { %978 = vst.msk [vmem:[#allocation3 + $0xf0] sm:$0xff] %vm947_vm5, %v912_v0 }
 0x208   : > { %1445 = vrot.lane.b32.xlu2 %v3152_v63, %s2315_s8 }
 0x209   : > { %1328 = vrot.lane.b32.xlu1 %v3154_v3, %s2316_s9 }
 0x20a   : > { %v995_v2 = vpop.permute.xlu2 %994 }
 0x20b   : > { %v987_v6 = vpop.permute.xlu1 %986  ;;  %1085 = vst.msk [vmem:[#allocation3 + $0x30] sm:$0xff] %vm1078_vm6, %v995_v2 }
 0x20c   : > { %1316 = vrot.lane.b32.xlu0 %v3124_v29, %s2316_s9  ;;  %1081 = vst.msk [vmem:[#allocation3 + $0x10] sm:$0xff] %vm1078_vm6, %v987_v6  ;;  %v3329_v6 = vld [vmem:[#allocation2 + $0x15a] sm:$0xff] }
 0x20e   : > { %v985_v11 = vpop.permute.xlu0 %984 }
 0x20f   : > { %1080 = vst.msk [vmem:[#allocation3 + $0x8] sm:$0xff] %vm1078_vm6, %v985_v11 }
 0x210   : > { %1197 = vrot.lane.b32.xlu2 %v3165_v8, %s2314_s7 }
 0x211   : > { %1459 = vrot.lane.b32.xlu1 %v3167_v12, %s2315_s8 }
 0x212   : > { %v1001_v18 = vpop.permute.xlu2 %1000 }
 0x213   : > { %v993_v20 = vpop.permute.xlu1 %992  ;;  %1088 = vst.msk [vmem:[#allocation3 + $0x48] sm:$0xff] %vm1078_vm6, %v1001_v18 }
 0x214   : > { %1447 = vrot.lane.b32.xlu0 %v3174_v14, %s2315_s8  ;;  %1084 = vst.msk [vmem:[#allocation3 + $0x28] sm:$0xff] %vm1078_vm6, %v993_v20  ;;  %v3335_v20 = vld [vmem:[#allocation2 + $0x112] sm:$0xff] }
 0x216   : > { %v991_v24 = vpop.permute.xlu0 %990 }
 0x217   : > { %1083 = vst.msk [vmem:[#allocation3 + $0x20] sm:$0xff] %vm1078_vm6, %v991_v24 }
 0x218   : > { %1211 = vrot.lane.b32.xlu2 %v3180_v23, %s2314_s7 }
 0x219   : > { %1187 = vrot.lane.b32.xlu1 %v3115_v25, %s2314_s7 }
 0x21a   : > { %v1007_v27 = vpop.permute.xlu2 %1006 }
 0x21b   : > { %v999_v28 = vpop.permute.xlu1 %998  ;;  %1091 = vst.msk [vmem:[#allocation3 + $0x60] sm:$0xff] %vm1078_vm6, %v1007_v27 }
 0x21c   : > { %1473 = vrot.lane.b32.xlu0 %v3187_v26, %s2315_s8  ;;  %1087 = vst.msk [vmem:[#allocation3 + $0x40] sm:$0xff] %vm1078_vm6, %v999_v28 }
 0x21e   : > { %v997_v37 = vpop.permute.xlu0 %996 }
 0x21f   : > { %1086 = vst.msk [vmem:[#allocation3 + $0x38] sm:$0xff] %vm1078_vm6, %v997_v37 }
 0x220   : > { %1342 = vrot.lane.b32.xlu2 %v3193_v30, %s2316_s9 }
 0x221   : > { %1330 = vrot.lane.b32.xlu1 %v3146_v57, %s2316_s9 }
 0x222   : > { %v1013_v38 = vpop.permute.xlu2 %1012 }
 0x223   : > { %v1005_v41 = vpop.permute.xlu1 %1004  ;;  %1094 = vst.msk [vmem:[#allocation3 + $0x78] sm:$0xff] %vm1078_vm6, %v1013_v38 }
 0x224   : > { %1318 = vrot.lane.b32.xlu0 %v3152_v63, %s2316_s9  ;;  %1090 = vst.msk [vmem:[#allocation3 + $0x58] sm:$0xff] %vm1078_vm6, %v1005_v41 }
 0x226   : > { %v1003_v43 = vpop.permute.xlu0 %1002 }
 0x227   : > { %1089 = vst.msk [vmem:[#allocation3 + $0x50] sm:$0xff] %vm1078_vm6, %v1003_v43 }
 0x228   : > { %1199 = vrot.lane.b32.xlu2 %v3130_v46, %s2314_s7 }
 0x229   : > { %1461 = vrot.lane.b32.xlu1 %v3204_v44, %s2315_s8 }
 0x22a   : > { %v1019_v47 = vpop.permute.xlu2 %1018 }
 0x22b   : > { %v1011_v49 = vpop.permute.xlu1 %1010  ;;  %1097 = vst.msk [vmem:[#allocation3 + $0x90] sm:$0xff] %vm1078_vm6, %v1019_v47 }
 0x22c   : > { %1449 = vrot.lane.b32.xlu0 %v3140_v52, %s2315_s8  ;;  %1093 = vst.msk [vmem:[#allocation3 + $0x70] sm:$0xff] %vm1078_vm6, %v1011_v49 }
 0x22e   : > { %v1009_v53 = vpop.permute.xlu0 %1008 }
 0x22f   : > { %1092 = vst.msk [vmem:[#allocation3 + $0x68] sm:$0xff] %vm1078_vm6, %v1009_v53 }
 0x230   : > { %1213 = vrot.lane.b32.xlu2 %v3215_v50, %s2314_s7 }
 0x231   : > { %1189 = vrot.lane.b32.xlu1 %v3124_v29, %s2314_s7 }
 0x232   : > { %v1025_v56 = vpop.permute.xlu2 %1024 }
 0x233   : > { %v1017_v59 = vpop.permute.xlu1 %1016  ;;  %1100 = vst.msk [vmem:[#allocation3 + $0xa8] sm:$0xff] %vm1078_vm6, %v1025_v56 }
 0x234   : > { %1475 = vrot.lane.b32.xlu0 %v3222_v55, %s2315_s8  ;;  %1096 = vst.msk [vmem:[#allocation3 + $0x88] sm:$0xff] %vm1078_vm6, %v1017_v59 }
 0x236   : > { %v1015_v62 = vpop.permute.xlu0 %1014 }
 0x237   : > { %1095 = vst.msk [vmem:[#allocation3 + $0x80] sm:$0xff] %vm1078_vm6, %v1015_v62 }
 0x238   : > { %1344 = vrot.lane.b32.xlu2 %v3228_v61, %s2316_s9 }
 0x239   : > { %1332 = vrot.lane.b32.xlu1 %v3167_v12, %s2316_s9 }
 0x23a   : > { %v1031_v1 = vpop.permute.xlu2 %1030 }
 0x23b   : > { %v1023_v4 = vpop.permute.xlu1 %1022  ;;  %1103 = vst.msk [vmem:[#allocation3 + $0xc0] sm:$0xff] %vm1078_vm6, %v1031_v1 }
 0x23c   : > { %1320 = vrot.lane.b32.xlu0 %v3174_v14, %s2316_s9  ;;  %1099 = vst.msk [vmem:[#allocation3 + $0xa0] sm:$0xff] %vm1078_vm6, %v1023_v4 }
 0x23e   : > { %v1021_v7 = vpop.permute.xlu0 %1020 }
 0x23f   : > { %1098 = vst.msk [vmem:[#allocation3 + $0x98] sm:$0xff] %vm1078_vm6, %v1021_v7 }
 0x240   : > { %1201 = vrot.lane.b32.xlu2 %v3154_v3, %s2314_s7 }
 0x241   : > { %1451 = vrot.lane.b32.xlu1 %v3165_v8, %s2315_s8 }
 0x242   : > { %v1037_v16 = vpop.permute.xlu2 %1036 }
 0x243   : > { %v1029_v31 = vpop.permute.xlu1 %1028  ;;  %1106 = vst.msk [vmem:[#allocation3 + $0xd8] sm:$0xff] %vm1078_vm6, %v1037_v16 }
 0x244   : > { %1227 = vrot.lane.b32.xlu0 %v3253_v13, %s2314_s7  ;;  %1102 = vst.msk [vmem:[#allocation3 + $0xb8] sm:$0xff] %vm1078_vm6, %v1029_v31 }
 0x246   : > { %v1027_v21 = vpop.permute.xlu0 %1026 }
 0x247   : > { %1101 = vst.msk [vmem:[#allocation3 + $0xb0] sm:$0xff] %vm1078_vm6, %v1027_v21 }
 0x248   : > { %1215 = vrot.lane.b32.xlu2 %v3193_v30, %s2314_s7 }
 0x249   : > { %1358 = vrot.lane.b32.xlu1 %v3265_v22, %s2316_s9 }
 0x24a   : > { %v1311_v33 = vpop.permute.xlu2 %1310 }
 0x24b   : > { %v1035_v25 = vpop.permute.xlu1 %1034 }
 0x24c   : > { %1346 = vrot.lane.b32.xlu0 %v3187_v26, %s2316_s9  ;;  %1105 = vst.msk [vmem:[#allocation3 + $0xd0] sm:$0xff] %vm1078_vm6, %v1035_v25 }
 0x24e   : > { %v1033_v34 = vpop.permute.xlu0 %1032 }
 0x24f   : > { %1104 = vst.msk [vmem:[#allocation3 + $0xc8] sm:$0xff] %vm1078_vm6, %v1033_v34 }
 0x250   : > { %1463 = vrot.lane.b32.xlu2 %v3275_v32, %s2315_s8 }
 0x251   : > { %1191 = vrot.lane.b32.xlu1 %v3152_v63, %s2314_s7  ;;  %v3310_v63 = vld [vmem:[#allocation2 + $0x142] sm:$0xff] }
 0x252   : > { %v1313_v36 = vpop.permute.xlu2 %1312 }
 0x253   : > { %v1180_v29 = vpop.permute.xlu1 %1179 }
 0x254   : > { %1489 = vrot.lane.b32.xlu0 %v3282_v35, %s2315_s8  ;;  %1276 = vst.msk [vmem:[#allocation3] sm:$0xff] %vm1275_vm8, %v1180_v29 }
 0x255   : > { %1407 = vst.msk [vmem:[#allocation3] sm:$0xff] %vm1406_vm9, %v1311_v33 }
 0x256   : > { %v1039_v40 = vpop.permute.xlu0 %1038 }
 0x257   : > { %1107 = vst.msk [vmem:[#allocation3 + $0xe0] sm:$0xff] %vm1078_vm6, %v1039_v40 }
 0x258   : > { %1477 = vrot.lane.b32.xlu2 %v3287_v39, %s2315_s8 }
 0x259   : > { %1334 = vrot.lane.b32.xlu1 %v3204_v44, %s2316_s9 }
 0x25a   : > { %v1196_v42 = vpop.permute.xlu2 %1195 }
 0x25b   : > { %v1182_v45 = vpop.permute.xlu1 %1181  ;;  %1284 = vst.msk [vmem:[#allocation3 + $0x40] sm:$0xff] %vm1275_vm8, %v1196_v42 }
 0x25c   : > { %1322 = vrot.lane.b32.xlu0 %v3140_v52, %s2316_s9  ;;  %1277 = vst.msk [vmem:[#allocation3 + $0x8] sm:$0xff] %vm1275_vm8, %v1182_v45 }
 0x25d   : > { %1408 = vst.msk [vmem:[#allocation3 + $0x8] sm:$0xff] %vm1406_vm9, %v1313_v36 }
 0x25e   : > { %v1442_v48 = vpop.permute.xlu0 %1441 }
 0x25f   : > { %1538 = vst.msk [vmem:[#allocation3] sm:$0xff] %vm1537_vm10, %v1442_v48 }
 0x260   : > { %1203 = vrot.lane.b32.xlu2 %v3146_v57, %s2314_s7 }
 0x261   : > { %1453 = vrot.lane.b32.xlu1 %v3130_v46, %s2315_s8 }
 0x262   : > { %v1446_v54 = vpop.permute.xlu2 %1445 }
 0x263   : > { %v1184_v58 = vpop.permute.xlu1 %1183 }
 0x264   : > { %1229 = vrot.lane.b32.xlu0 %v3305_v51, %s2314_s7  ;;  %1278 = vst.msk [vmem:[#allocation3 + $0x10] sm:$0xff] %vm1275_vm8, %v1184_v58 }
 0x266   : > { %v1444_v52 = vpop.permute.xlu0 %1443  ;;  %v1570_v60 = vld [vmem:[#allocation3] sm:$0xff] }
 0x267   : > { %1539 = vst.msk [vmem:[#allocation3 + $0x8] sm:$0xff] %vm1537_vm10, %v1444_v52  ;;  %2143 = vmatmul.msk.f32.vlgmr.msra.gmra.mxu0 %vm1607_vm11, %v1570_v60 }
 0x268   : > { %1217 = vrot.lane.b32.xlu2 %v3228_v61, %s2314_s7 }
 0x269   : > { %1360 = vrot.lane.b32.xlu1 %v3310_v63, %s2316_s9 }
 0x26a   : > { %v1198_v46 = vpop.permute.xlu2 %1197 }
 0x26b   : > { %v1327_v57 = vpop.permute.xlu1 %1326  ;;  %1285 = vst.msk [vmem:[#allocation3 + $0x48] sm:$0xff] %vm1275_vm8, %v1198_v46 }
 0x26c   : > { %1348 = vrot.lane.b32.xlu0 %v3222_v55, %s2316_s9  ;;  %1415 = vst.msk [vmem:[#allocation3 + $0x40] sm:$0xff] %vm1406_vm9, %v1327_v57 }
 0x26e   : > { %v1315_v0 = vpop.permute.xlu0 %1314  ;;  %v1571_v2 = vld [vmem:[#allocation3 + $0x8] sm:$0xff] }
 0x26f   : > { %1409 = vst.msk [vmem:[#allocation3 + $0x10] sm:$0xff] %vm1406_vm9, %v1315_v0  ;;  %2144 = vmatmul.msk.f32.gmra.mxu0 %vm1607_vm11, %v1571_v2  ;;  %v687_v2 = vld [vmem:[#allocation2 + $0x1a1] sm:$0xff] }
 0x270   : > { %1540 = vst.msk [vmem:[#allocation3 + $0x10] sm:$0xff] %vm1537_vm10, %v1446_v54  ;;  %1465 = vrot.lane.b32.xlu2 %v3180_v23, %s2315_s8  ;;  %v3450_v54 = vld [vmem:[#allocation2 + $0x18a] sm:$0xff] }
 0x271   : > { %1193 = vrot.lane.b32.xlu1 %v3174_v14, %s2314_s7 }
 0x272   : > { %v1212_v11 = vpop.permute.xlu2 %1211 }
 0x273   : > { %v1186_v18 = vpop.permute.xlu1 %1185  ;;  %1292 = vst.msk [vmem:[#allocation3 + $0x80] sm:$0xff] %vm1275_vm8, %v1212_v11 }
 0x274   : > { %1491 = vrot.lane.b32.xlu0 %v3329_v6, %s2315_s8  ;;  %1279 = vst.msk [vmem:[#allocation3 + $0x18] sm:$0xff] %vm1275_vm8, %v1186_v18 }
 0x276   : > { %v1458_v24 = vpop.permute.xlu0 %1457 }
 0x277   : > { %1546 = vst.msk [vmem:[#allocation3 + $0x40] sm:$0xff] %vm1537_vm10, %v1458_v24  ;;  %v1572_v27 = vld [vmem:[#allocation3 + $0x10] sm:$0xff] }
 0x278   : > { %2145 = vmatmul.msk.f32.gmra.mxu0 %vm1607_vm11, %v1572_v27  ;;  %1479 = vrot.lane.b32.xlu2 %v3335_v20, %s2315_s8 }
 0x279   : > { %1336 = vrot.lane.b32.xlu1 %v3275_v32, %s2316_s9 }
 0x27a   : > { %v1343_v14 = vpop.permute.xlu2 %1342 }
 0x27b   : > { %v1329_v28 = vpop.permute.xlu1 %1328  ;;  %1423 = vst.msk [vmem:[#allocation3 + $0x80] sm:$0xff] %vm1406_vm9, %v1343_v14  ;;  %v1146_v14 = vld [vmem:[#allocation2 + $0x1a2] sm:$0xff] }
 0x27c   : > { %1324 = vrot.lane.b32.xlu0 %v3165_v8, %s2316_s9  ;;  %1416 = vst.msk [vmem:[#allocation3 + $0x48] sm:$0xff] %vm1406_vm9, %v1329_v28 }
 0x27e   : > { %v1317_v37 = vpop.permute.xlu0 %1316  ;;  %v1578_v38 = vld [vmem:[#allocation3 + $0x40] sm:$0xff] }
 0x27f   : > { %1410 = vst.msk [vmem:[#allocation3 + $0x18] sm:$0xff] %vm1406_vm9, %v1317_v37  ;;  %2151 = vmatmul.msk.f32.vlgmr.msra.gmra.mxu1 %vm1607_vm11, %v1578_v38 }
 0x280   : > { %1205 = vrot.lane.b32.xlu2 %v3167_v12, %s2314_s7 }
 0x281   : > { %1455 = vrot.lane.b32.xlu1 %v3154_v3, %s2315_s8 }
 0x282   : > { %v1200_v41 = vpop.permute.xlu2 %1199 }
 0x283   : > { %v1460_v43 = vpop.permute.xlu1 %1459  ;;  %1286 = vst.msk [vmem:[#allocation3 + $0x50] sm:$0xff] %vm1275_vm8, %v1200_v41 }
 0x284   : > { %1231 = vrot.lane.b32.xlu0 %v3265_v22, %s2314_s7  ;;  %1547 = vst.msk [vmem:[#allocation3 + $0x48] sm:$0xff] %vm1537_vm10, %v1460_v43 }
 0x286   : > { %v1448_v8 = vpop.permute.xlu0 %1447 }
 0x287   : > { %1541 = vst.msk [vmem:[#allocation3 + $0x18] sm:$0xff] %vm1537_vm10, %v1448_v8 }
 0x288   : > { %1219 = vrot.lane.b32.xlu2 %v3187_v26, %s2314_s7  ;;  %v3373_v26 = vld [vmem:[#allocation2 + $0x16a] sm:$0xff] }
 0x289   : > { %1362 = vrot.lane.b32.xlu1 %v3282_v35, %s2316_s9 }
 0x28a   : > { %v1214_v12 = vpop.permute.xlu2 %1213 }
 0x28b   : > { %v1188_v3 = vpop.permute.xlu1 %1187  ;;  %1293 = vst.msk [vmem:[#allocation3 + $0x88] sm:$0xff] %vm1275_vm8, %v1214_v12  ;;  %v1579_v47 = vld [vmem:[#allocation3 + $0x48] sm:$0xff] }
 0x28c   : > { %1350 = vrot.lane.b32.xlu0 %v3287_v39, %s2316_s9  ;;  %1280 = vst.msk [vmem:[#allocation3 + $0x20] sm:$0xff] %vm1275_vm8, %v1188_v3  ;;  %2152 = vmatmul.msk.f32.gmra.mxu1 %vm1607_vm11, %v1579_v47 }
 0x28e   : > { %v1474_v49 = vpop.permute.xlu0 %1473  ;;  %v1573_v53 = vld [vmem:[#allocation3 + $0x18] sm:$0xff] }
 0x28f   : > { %1554 = vst.msk [vmem:[#allocation3 + $0x80] sm:$0xff] %vm1537_vm10, %v1474_v49  ;;  %2146 = vmatmul.msk.f32.gmra.mxu0 %vm1607_vm11, %v1573_v53 }
 0x290   : > { %1467 = vrot.lane.b32.xlu2 %v3215_v50, %s2315_s8 }
 0x291   : > { %1207 = vrot.lane.b32.xlu1 %v3204_v44, %s2314_s7 }
 0x292   : > { %v1345_v56 = vpop.permute.xlu2 %1344 }
 0x293   : > { %v1331_v59 = vpop.permute.xlu1 %1330  ;;  %1424 = vst.msk [vmem:[#allocation3 + $0x88] sm:$0xff] %vm1406_vm9, %v1345_v56 }
 0x294   : > { %1493 = vrot.lane.b32.xlu0 %v3373_v26, %s2315_s8  ;;  %1417 = vst.msk [vmem:[#allocation3 + $0x50] sm:$0xff] %vm1406_vm9, %v1331_v59 }
 0x296   : > { %v1319_v62 = vpop.permute.xlu0 %1318  ;;  %v1586_v1 = vld [vmem:[#allocation3 + $0x80] sm:$0xff] }
 0x297   : > { %1411 = vst.msk [vmem:[#allocation3 + $0x20] sm:$0xff] %vm1406_vm9, %v1319_v62  ;;  %2159 = vmatmul.msk.f32.vlgmr.msra.gmra.mxu2 %vm1607_vm11, %v1586_v1 }
 0x298   : > { %1481 = vrot.lane.b32.xlu2 %v3253_v13, %s2315_s8 }
 0x299   : > { %1233 = vrot.lane.b32.xlu1 %v3310_v63, %s2314_s7 }
 0x29a   : > { %v1202_v44 = vpop.permute.xlu2 %1201 }
 0x29b   : > { %v1462_v4 = vpop.permute.xlu1 %1461  ;;  %1287 = vst.msk [vmem:[#allocation3 + $0x58] sm:$0xff] %vm1275_vm8, %v1202_v44 }
 0x29c   : > { %1221 = vrot.lane.b32.xlu0 %v3222_v55, %s2314_s7  ;;  %1548 = vst.msk [vmem:[#allocation3 + $0x50] sm:$0xff] %vm1537_vm10, %v1462_v4 }
 0x29e   : > { %v1450_v5 = vpop.permute.xlu0 %1449 }
 0x29f   : > { %1542 = vst.msk [vmem:[#allocation3 + $0x20] sm:$0xff] %vm1537_vm10, %v1450_v5 }
 0x2a0   : > { %1338 = vrot.lane.b32.xlu2 %v3180_v23, %s2316_s9  ;;  %v3405_v23 = vld [vmem:[#allocation2 + $0x172] sm:$0xff] }
 0x2a1   : > { %1364 = vrot.lane.b32.xlu1 %v3329_v6, %s2316_s9 }
 0x2a2   : > { %v1216_v7 = vpop.permute.xlu2 %1215 }
 0x2a3   : > { %v1190_v9 = vpop.permute.xlu1 %1189  ;;  %1294 = vst.msk [vmem:[#allocation3 + $0x90] sm:$0xff] %vm1275_vm8, %v1216_v7  ;;  %v1580_v10 = vld [vmem:[#allocation3 + $0x50] sm:$0xff] }
 0x2a4   : > { %1352 = vrot.lane.b32.xlu0 %v3335_v20, %s2316_s9  ;;  %1281 = vst.msk [vmem:[#allocation3 + $0x28] sm:$0xff] %vm1275_vm8, %v1190_v9  ;;  %2153 = vmatmul.msk.f32.gmra.mxu1 %vm1607_vm11, %v1580_v10 }
 0x2a6   : > { %v1476_v55 = vpop.permute.xlu0 %1475  ;;  %v1574_v15 = vld [vmem:[#allocation3 + $0x20] sm:$0xff] }
 0x2a7   : > { %1555 = vst.msk [vmem:[#allocation3 + $0x88] sm:$0xff] %vm1537_vm10, %v1476_v55  ;;  %2147 = vmatmul.msk.f32.gmra.mxu0 %vm1607_vm11, %v1574_v15 }
 0x2a8   : > { %1469 = vrot.lane.b32.xlu2 %v3193_v30, %s2315_s8 }
 0x2a9   : > { %1209 = vrot.lane.b32.xlu1 %v3275_v32, %s2314_s7 }
 0x2aa   : > { %v1464_v16 = vpop.permute.xlu2 %1463 }
 0x2ab   : > { %v1333_v31 = vpop.permute.xlu1 %1332 }
 0x2ac   : > { %1495 = vrot.lane.b32.xlu0 %v3405_v23, %s2315_s8  ;;  %1418 = vst.msk [vmem:[#allocation3 + $0x58] sm:$0xff] %vm1406_vm9, %v1333_v31 }
 0x2ad   : > { %1549 = vst.msk [vmem:[#allocation3 + $0x58] sm:$0xff] %vm1537_vm10, %v1464_v16 }
 0x2ae   : > { %v1321_v19 = vpop.permute.xlu0 %1320  ;;  %v1587_v21 = vld [vmem:[#allocation3 + $0x88] sm:$0xff] }
 0x2af   : > { %1412 = vst.msk [vmem:[#allocation3 + $0x28] sm:$0xff] %vm1406_vm9, %v1321_v19  ;;  %2160 = vmatmul.msk.f32.gmra.mxu2 %vm1607_vm11, %v1587_v21 }
 0x2b0   : > { %1483 = vrot.lane.b32.xlu2 %v3305_v51, %s2315_s8 }
 0x2b1   : > { %1235 = vrot.lane.b32.xlu1 %v3282_v35, %s2314_s7 }
 0x2b2   : > { %v1478_v30 = vpop.permute.xlu2 %1477 }
 0x2b3   : > { %v1452_v33 = vpop.permute.xlu1 %1451 }
 0x2b4   : > { %1223 = vrot.lane.b32.xlu0 %v3287_v39, %s2314_s7  ;;  %1543 = vst.msk [vmem:[#allocation3 + $0x28] sm:$0xff] %vm1537_vm10, %v1452_v33  ;;  %v1581_v25 = vld [vmem:[#allocation3 + $0x58] sm:$0xff] }
 0x2b5   : > { %2154 = vmatmul.msk.f32.gmra.mxu1 %vm1607_vm11, %v1581_v25 }
 0x2b6   : > { %v1228_v32 = vpop.permute.xlu0 %1227 }
 0x2b7   : > { %1300 = vst.msk [vmem:[#allocation3 + $0xc0] sm:$0xff] %vm1275_vm8, %v1228_v32 }
 0x2b8   : > { %1340 = vrot.lane.b32.xlu2 %v3215_v50, %s2316_s9  ;;  %v1143_v50 = vld [vmem:[#allocation2 + $0x182] sm:$0xff] }
 0x2b9   : > { %1366 = vrot.lane.b32.xlu1 %v3373_v26, %s2316_s9 }
 0x2ba   : > { %v1204_v34 = vpop.permute.xlu2 %1203 }
 0x2bb   : > { %v1359_v35 = vpop.permute.xlu1 %1358  ;;  %v1575_v36 = vld [vmem:[#allocation3 + $0x28] sm:$0xff]  ;;  %1288 = vst.msk [vmem:[#allocation3 + $0x60] sm:$0xff] %vm1275_vm8, %v1204_v34 }
 0x2bc   : > { %1354 = vrot.lane.b32.xlu0 %v3253_v13, %s2316_s9  ;;  %1431 = vst.msk [vmem:[#allocation3 + $0xc0] sm:$0xff] %vm1406_vm9, %v1359_v35  ;;  %2148 = vmatmul.msk.f32.gmra.mxu0 %vm1607_vm11, %v1575_v36 }
 0x2be   : > { %v1347_v29 = vpop.permute.xlu0 %1346 }
 0x2bf   : > { %1425 = vst.msk [vmem:[#allocation3 + $0x90] sm:$0xff] %vm1406_vm9, %v1347_v29 }
 0x2c0   : > { %1556 = vst.msk [vmem:[#allocation3 + $0x90] sm:$0xff] %vm1537_vm10, %v1478_v30  ;;  %1471 = vrot.lane.b32.xlu2 %v3228_v61, %s2315_s8 }
 0x2c1   : > { %1040 = vrot.lane.b32.xlu1 %v3009_v17, %s2313_s6 }
 0x2c2   : > { %v1218_v39 = vpop.permute.xlu2 %1217 }
 0x2c3   : > { %v1192_v40 = vpop.permute.xlu1 %1191  ;;  %1295 = vst.msk [vmem:[#allocation3 + $0x98] sm:$0xff] %vm1275_vm8, %v1218_v39 }
 0x2c4   : > { %1497 = vrot.lane.b32.xlu0 %v1143_v50, %s2315_s8  ;;  %1282 = vst.msk [vmem:[#allocation3 + $0x30] sm:$0xff] %vm1275_vm8, %v1192_v40 }
 0x2c6   : > { %v1490_v13 = vpop.permute.xlu0 %1489 }
 0x2c7   : > { %1562 = vst.msk [vmem:[#allocation3 + $0xc0] sm:$0xff] %vm1537_vm10, %v1490_v13  ;;  %v1588_v42 = vld [vmem:[#allocation3 + $0x90] sm:$0xff] }
 0x2c8   : > { %2161 = vmatmul.msk.f32.gmra.mxu2 %vm1607_vm11, %v1588_v42  ;;  %1485 = vrot.lane.b32.xlu2 %v3265_v22, %s2315_s8 }
 0x2c9   : > { %1356 = vrot.lane.b32.xlu1 %v3305_v51, %s2316_s9 }
 0x2ca   : > { %v1466_v17 = vpop.permute.xlu2 %1465 }
 0x2cb   : > { %v1335_v61 = vpop.permute.xlu1 %1334 }
 0x2cc   : > { %1237 = vrot.lane.b32.xlu0 %v3329_v6, %s2314_s7  ;;  %1419 = vst.msk [vmem:[#allocation3 + $0x60] sm:$0xff] %vm1406_vm9, %v1335_v61 }
 0x2cd   : > { %1550 = vst.msk [vmem:[#allocation3 + $0x60] sm:$0xff] %vm1537_vm10, %v1466_v17 }
 0x2ce   : > { %v1323_v45 = vpop.permute.xlu0 %1322  ;;  %v1594_v48 = vld [vmem:[#allocation3 + $0xc0] sm:$0xff] }
 0x2cf   : > { %1413 = vst.msk [vmem:[#allocation3 + $0x30] sm:$0xff] %vm1406_vm9, %v1323_v45  ;;  %2167 = vmatmul.msk.f32.vlgmr.msra.gmra.mxu3 %vm1607_vm11, %v1594_v48 }
 0x2d0   : > { %1225 = vrot.lane.b32.xlu2 %v3335_v20, %s2314_s7  ;;  %v1145_v20 = vld [vmem:[#allocation2 + $0x19a] sm:$0xff] }
 0x2d1   : > { %1499 = vrot.lane.b32.xlu1 %v3450_v54, %s2315_s8 }
 0x2d2   : > { %v1480_v22 = vpop.permute.xlu2 %1479 }
 0x2d3   : > { %v1454_v51 = vpop.permute.xlu1 %1453 }
 0x2d4   : > { %1487 = vrot.lane.b32.xlu0 %v3310_v63, %s2315_s8  ;;  %1544 = vst.msk [vmem:[#allocation3 + $0x30] sm:$0xff] %vm1537_vm10, %v1454_v51  ;;  %v1582_v58 = vld [vmem:[#allocation3 + $0x60] sm:$0xff]  ;;  %v686_v63 = vld [vmem:[#allocation2 + $0x199] sm:$0xff] }
 0x2d5   : > { %2155 = vmatmul.msk.f32.gmra.mxu1 %vm1607_vm11, %v1582_v58 }
 0x2d6   : > { %v1230_v52 = vpop.permute.xlu0 %1229 }
 0x2d7   : > { %1301 = vst.msk [vmem:[#allocation3 + $0xc8] sm:$0xff] %vm1275_vm8, %v1230_v52 }
 0x2d8   : > { %1368 = vrot.lane.b32.xlu2 %v3405_v23, %s2316_s9 }
 0x2d9   : > { %1370 = vrot.lane.b32.xlu1 %v1143_v50, %s2316_s9 }
 0x2da   : > { %v1206_v60 = vpop.permute.xlu2 %1205 }
 0x2db   : > { %v1361_v46 = vpop.permute.xlu1 %1360  ;;  %v1576_v57 = vld [vmem:[#allocation3 + $0x30] sm:$0xff]  ;;  %1289 = vst.msk [vmem:[#allocation3 + $0x68] sm:$0xff] %vm1275_vm8, %v1206_v60 }
 0x2dc   : > { %1239 = vrot.lane.b32.xlu0 %v3373_v26, %s2314_s7  ;;  %1432 = vst.msk [vmem:[#allocation3 + $0xc8] sm:$0xff] %vm1406_vm9, %v1361_v46  ;;  %2149 = vmatmul.msk.f32.gmra.mxu0 %vm1607_vm11, %v1576_v57 }
 0x2de   : > { %v1349_v0 = vpop.permute.xlu0 %1348 }
 0x2df   : > { %1426 = vst.msk [vmem:[#allocation3 + $0x98] sm:$0xff] %vm1406_vm9, %v1349_v0 }
 0x2e0   : > { %1557 = vst.msk [vmem:[#allocation3 + $0x98] sm:$0xff] %vm1537_vm10, %v1480_v22  ;;  %1042 = vrot.lane.b32.xlu2 %v686_v63, %s2313_s6 }
 0x2e1   : > { %1241 = vrot.lane.b32.xlu1 %v3405_v23, %s2314_s7 }
 0x2e2   : > { %v1220_v6 = vpop.permute.xlu2 %1219 }
 0x2e3   : > { %v1194_v11 = vpop.permute.xlu1 %1193  ;;  %1296 = vst.msk [vmem:[#allocation3 + $0xa0] sm:$0xff] %vm1275_vm8, %v1220_v6 }
 0x2e4   : > { %1044 = vrot.lane.b32.xlu0 %v687_v2, %s2313_s6  ;;  %v1725_v18 = vpop.f32.mrf.mxu0  ;;  %1283 = vst.msk [vmem:[#allocation3 + $0x38] sm:$0xff] %vm1275_vm8, %v1194_v11  ;;  %s2176_s6 = sshll.u32 %s2358_s16, 1  ;;  %s2031_s16 = scalar_lea.sflag [#allocation5], %s169_s24 }
 0x2e5   : > { %1821 = vst.msk [vmem:[%s3481_s10] sm:$0xff] %vm215_vm1, %v1725_v18  ;;  %v1923_v37 = vmul.f32 %v1725_v18, %v1725_v18  ;;  %v1853_v43 = vsel %vm215_vm1, %v1725_v18, 0.0 }
 0x2e6   : > { %v1492_v24 = vpop.permute.xlu0 %1491 }
 0x2e7   : > { %1563 = vst.msk [vmem:[#allocation3 + $0xc8] sm:$0xff] %vm1537_vm10, %v1492_v24  ;;  %v1589_v27 = vld [vmem:[#allocation3 + $0x98] sm:$0xff]  ;;  %v1955_v53 = vsel %vm215_vm1, %v1923_v37, 0.0 }
 0x2e8   : > { %2162 = vmatmul.msk.f32.gmra.mxu2 %vm1607_vm11, %v1589_v27  ;;  %1501 = vrot.lane.b32.xlu2 %v1145_v20, %s2315_s8 }
 0x2ea   : > { %v1468_v28 = vpop.permute.xlu2 %1467 }
 0x2eb   : > { %v1337_v38 = vpop.permute.xlu1 %1336 }
 0x2ec   : > { %1503 = vrot.lane.b32.xlu0 %v1146_v14, %s2315_s8  ;;  %v1728_v41 = vpop.f32.mrf.mxu0  ;;  %1420 = vst.msk [vmem:[#allocation3 + $0x68] sm:$0xff] %vm1406_vm9, %v1337_v38 }
 0x2ed   : > { %1822 = vst.msk [vmem:[%s3481_s10 + $0x8] sm:$0xff] %vm215_vm1, %v1728_v41  ;;  %v1854_v8 = vsel %vm215_vm1, %v1728_v41, 0.0  ;;  %v1924_v12 = vmul.f32 %v1728_v41, %v1728_v41 }
 0x2ee   : > { %v1855_v3 = vadd.f32 %v1854_v8, %v1853_v43  ;;  %v1325_v47 = vpop.permute.xlu0 %1324  ;;  %v1595_v49 = vld [vmem:[#allocation3 + $0xc8] sm:$0xff]  ;;  %1551 = vst.msk [vmem:[#allocation3 + $0x68] sm:$0xff] %vm1537_vm10, %v1468_v28 }
 0x2ef   : > { %v1956_v26 = vsel %vm215_vm1, %v1924_v12, 0.0  ;;  %1414 = vst.msk [vmem:[#allocation3 + $0x38] sm:$0xff] %vm1406_vm9, %v1325_v47  ;;  %2168 = vmatmul.msk.f32.gmra.mxu3 %vm1607_vm11, %v1595_v49 }
 0x2f0   : > { %v1957_v56 = vadd.f32 %v1956_v26, %v1955_v53  ;;  %1372 = vrot.lane.b32.xlu2 %v3450_v54, %s2316_s9  ;;  %s2044_s9 = scalar_lea.hbm %s3780_s3, %s2176_s6 }
 0x2f1   : > { %s2048_s19 = sshll.u32 %s2044_s9, 4  ;;  %s2049_s19 = int_to_ptr.hbm [resolvable:$true] %s2048_s19 }
 0x2f2   : > { %v1482_v59 = vpop.permute.xlu2 %1481  ;;  %s2258_s20 = sshra.s32 %s2049_s19, 4  ;;  %s2259_s20 = int_to_ptr.hbm [resolvable:$true] %s2258_s20 }
 0x2f3   : > { %v1456_v62 = vpop.permute.xlu1 %1455  ;;  %s2260_s26 = scalar_lea.hbm %s2259_s20, 2  ;;  %p2265_p0 = scmp.lt.s32.totalorder %s2259_s20, %s3780_s3 }
 0x2f4   : > { %1545 = vst.msk [vmem:[#allocation3 + $0x38] sm:$0xff] %vm1537_vm10, %v1456_v62  ;;  %p2261_p11 = scmp.ne.s32.totalorder %s2259_s20, %s2260_s26  ;;  %p2266_p1 = scmp.lt.s32.totalorder %s2264_s29, %s2260_s26 }
 0x2f5   : > { %v1731_v1 = vpop.f32.mrf.mxu0  ;;  %v1583_v44 = vld [vmem:[#allocation3 + $0x68] sm:$0xff] }
 0x2f6   : > { %1823 = vst.msk [vmem:[%s3481_s10 + $0x10] sm:$0xff] %vm215_vm1, %v1731_v1  ;;  %v1856_v4 = vsel %vm215_vm1, %v1731_v1, 0.0  ;;  %v1925_v5 = vmul.f32 %v1731_v1, %v1731_v1  ;;  %v1232_v7 = vpop.permute.xlu0 %1231  ;;  %2156 = vmatmul.msk.f32.gmra.mxu1 %vm1607_vm11, %v1583_v44  ;;  %p2262_p12 = pnand %p2261_p11, %p2375_p5  ;;  %p2267_p2 = por %p2266_p1, %p2265_p0 }
 0x2f7   : > { %v1857_v9 = vadd.f32 %v1856_v4, %v1855_v3  ;;  %1302 = vst.msk [vmem:[#allocation3 + $0xd0] sm:$0xff] %vm1275_vm8, %v1232_v7 }
 0x2f8   : > { %v1958_v10 = vsel %vm215_vm1, %v1925_v5, 0.0  ;;  %p2263_p13 = pneg %p2262_p12 }
 0x2f9   : > { %v1959_v55 = vadd.f32 %v1958_v10, %v1957_v56 }
 0x2fa   : > { %v1339_v15 = vpop.permute.xlu2 %1338  ;;  %p2268_p3 = pnand %p2267_p2, %p2263_p13 }
 0x2fb   : > { %v1363_v23 = vpop.permute.xlu1 %1362  ;;  %v1577_v16 = vld [vmem:[#allocation3 + $0x38] sm:$0xff] }
 0x2fc   : > { %v3511_v31 = vpop.f32.mrf.mxu1  ;;  %1433 = vst.msk [vmem:[#allocation3 + $0xd0] sm:$0xff] %vm1406_vm9, %v1363_v23  ;;  %2150 = vmatmul.msk.f32.gmra.mxu0 %vm1607_vm11, %v1577_v16 }
 0x2fd   : > { %1829 = vst.msk [vmem:[%s3481_s10 + $0x40] sm:$0xff] %vm215_vm1, %v3511_v31 }
 0x2fe   : > { %v1351_v19 = vpop.permute.xlu0 %1350 }
 0x2ff   : > { %1427 = vst.msk [vmem:[#allocation3 + $0xa0] sm:$0xff] %vm1406_vm9, %v1351_v19 }
 0x300   : > { %1558 = vst.msk [vmem:[#allocation3 + $0xa0] sm:$0xff] %vm1537_vm10, %v1482_v59 }
 0x302   : > { %v1470_v21 = vpop.permute.xlu2 %1469 }
 0x303   : > { %v1208_v30 = vpop.permute.xlu1 %1207 }
 0x304   : > { %1290 = vst.msk [vmem:[#allocation3 + $0x70] sm:$0xff] %vm1275_vm8, %v1208_v30 }
 0x305   : > { %1421 = vst.msk [vmem:[#allocation3 + $0x70] sm:$0xff] %vm1406_vm9, %v1339_v15 }
 0x306   : > { %v1494_v33 = vpop.permute.xlu0 %1493  ;;  %1552 = vst.msk [vmem:[#allocation3 + $0x70] sm:$0xff] %vm1537_vm10, %v1470_v21 }
 0x307   : > { %1564 = vst.msk [vmem:[#allocation3 + $0xd0] sm:$0xff] %vm1537_vm10, %v1494_v33  ;;  %v1590_v25 = vld [vmem:[#allocation3 + $0xa0] sm:$0xff] }
 0x308   : > { %2163 = vmatmul.msk.f32.gmra.mxu2 %vm1607_vm11, %v1590_v25 }
 0x309   : > { %v3525_v32 = vpop.f32.mrf.mxu1 }
 0x30a   : > { %v1484_v34 = vpop.permute.xlu2 %1483  ;;  %1830 = vst.msk [vmem:[%s3481_s10 + $0x48] sm:$0xff] %vm215_vm1, %v3525_v32 }
 0x30b   : > { %v1234_v35 = vpop.permute.xlu1 %1233 }
 0x30c   : > { %v1734_v36 = vpop.f32.mrf.mxu0  ;;  %1303 = vst.msk [vmem:[#allocation3 + $0xd8] sm:$0xff] %vm1275_vm8, %v1234_v35 }
 0x30d   : > { %1824 = vst.msk [vmem:[%s3481_s10 + $0x18] sm:$0xff] %vm215_vm1, %v1734_v36  ;;  %v1858_v29 = vsel %vm215_vm1, %v1734_v36, 0.0  ;;  %v1926_v50 = vmul.f32 %v1734_v36, %v1734_v36  ;;  %v1584_v39 = vld [vmem:[#allocation3 + $0x70] sm:$0xff] }
 0x30e   : > { %v1859_v40 = vadd.f32 %v1858_v29, %v1857_v9  ;;  %v1222_v13 = vpop.permute.xlu0 %1221  ;;  %v1596_v42 = vld [vmem:[#allocation3 + $0xd0] sm:$0xff]  ;;  %2157 = vmatmul.msk.f32.gmra.mxu1 %vm1607_vm11, %v1584_v39 }
 0x30f   : > { %v1960_v17 = vsel %vm215_vm1, %v1926_v50, 0.0  ;;  %1297 = vst.msk [vmem:[#allocation3 + $0xa8] sm:$0xff] %vm1275_vm8, %v1222_v13  ;;  %2169 = vmatmul.msk.f32.gmra.mxu3 %vm1607_vm11, %v1596_v42 }
 0x310   : > { %v1961_v61 = vadd.f32 %v1960_v17, %v1959_v55 }
 0x312   : > { %v1341_v45 = vpop.permute.xlu2 %1340 }
 0x313   : > { %v1365_v48 = vpop.permute.xlu1 %1364 }
 0x314   : > { %1434 = vst.msk [vmem:[#allocation3 + $0xd8] sm:$0xff] %vm1406_vm9, %v1365_v48 }
 0x316   : > { %v1353_v54 = vpop.permute.xlu0 %1352 }
 0x317   : > { %1428 = vst.msk [vmem:[#allocation3 + $0xa8] sm:$0xff] %vm1406_vm9, %v1353_v54 }
 0x318   : > { %1559 = vst.msk [vmem:[#allocation3 + $0xa8] sm:$0xff] %vm1537_vm10, %v1484_v34 }
 0x31a   : > { %v3541_v22 = vpop.f32.mrf.mxu2  ;;  %v1472_v51 = vpop.permute.xlu2 %1471 }
 0x31b   : > { %1837 = vst.msk [vmem:[%s3481_s10 + $0x80] sm:$0xff] %vm215_vm1, %v3541_v22  ;;  %v1210_v58 = vpop.permute.xlu1 %1209 }
 0x31c   : > { %1291 = vst.msk [vmem:[#allocation3 + $0x78] sm:$0xff] %vm1275_vm8, %v1210_v58 }
 0x31d   : > { %1422 = vst.msk [vmem:[#allocation3 + $0x78] sm:$0xff] %vm1406_vm9, %v1341_v45 }
 0x31e   : > { %v1496_v52 = vpop.permute.xlu0 %1495  ;;  %1553 = vst.msk [vmem:[#allocation3 + $0x78] sm:$0xff] %vm1537_vm10, %v1472_v51  ;;  %v1931_v51 = vmul.f32 %v3511_v31, %v3511_v31 }
 0x31f   : > { %1565 = vst.msk [vmem:[#allocation3 + $0xd8] sm:$0xff] %vm1537_vm10, %v1496_v52  ;;  %v1591_v60 = vld [vmem:[#allocation3 + $0xa8] sm:$0xff] }
 0x320   : > { %2164 = vmatmul.msk.f32.gmra.mxu2 %vm1607_vm11, %v1591_v60 }
 0x321   : > { %v3551_v46 = vpop.f32.mrf.mxu1 }
 0x322   : > { %1831 = vst.msk [vmem:[%s3481_s10 + $0x50] sm:$0xff] %vm215_vm1, %v3551_v46  ;;  %v1486_v57 = vpop.permute.xlu2 %1485 }
 0x323   : > { %v1236_v63 = vpop.permute.xlu1 %1235 }
 0x324   : > { %v1737_v0 = vpop.f32.mrf.mxu0  ;;  %1304 = vst.msk [vmem:[#allocation3 + $0xe0] sm:$0xff] %vm1275_vm8, %v1236_v63  ;;  %v1932_v63 = vmul.f32 %v3525_v32, %v3525_v32 }
 0x325   : > { %1825 = vst.msk [vmem:[%s3481_s10 + $0x20] sm:$0xff] %vm215_vm1, %v1737_v0  ;;  %v1860_v2 = vsel %vm215_vm1, %v1737_v0, 0.0  ;;  %v1927_v6 = vmul.f32 %v1737_v0, %v1737_v0  ;;  %v1585_v11 = vld [vmem:[#allocation3 + $0x78] sm:$0xff] }
 0x326   : > { %v1861_v18 = vadd.f32 %v1860_v2, %v1859_v40  ;;  %v1224_v20 = vpop.permute.xlu0 %1223  ;;  %v1597_v24 = vld [vmem:[#allocation3 + $0xd8] sm:$0xff]  ;;  %2158 = vmatmul.msk.f32.gmra.mxu1 %vm1607_vm11, %v1585_v11  ;;  %v1970_v11 = vsel %vm215_vm1, %v1931_v51, 0.0 }
 0x327   : > { %v1962_v27 = vsel %vm215_vm1, %v1927_v6, 0.0  ;;  %1298 = vst.msk [vmem:[#allocation3 + $0xb0] sm:$0xff] %vm1275_vm8, %v1224_v20  ;;  %2170 = vmatmul.msk.f32.gmra.mxu3 %vm1607_vm11, %v1597_v24  ;;  %v1933_v20 = vmul.f32 %v3551_v46, %v3551_v46 }
 0x328   : > { %v1963_v14 = vadd.f32 %v1962_v27, %v1961_v61 }
 0x32a   : > { %v1226_v28 = vpop.permute.xlu2 %1225 }
 0x32b   : > { %v1367_v37 = vpop.permute.xlu1 %1366  ;;  %1299 = vst.msk [vmem:[#allocation3 + $0xb8] sm:$0xff] %vm1275_vm8, %v1226_v28 }
 0x32c   : > { %1435 = vst.msk [vmem:[#allocation3 + $0xe0] sm:$0xff] %vm1406_vm9, %v1367_v37 }
 0x32e   : > { %v1355_v38 = vpop.permute.xlu0 %1354 }
 0x32f   : > { %1429 = vst.msk [vmem:[#allocation3 + $0xb0] sm:$0xff] %vm1406_vm9, %v1355_v38 }
 0x330   : > { %1560 = vst.msk [vmem:[#allocation3 + $0xb0] sm:$0xff] %vm1537_vm10, %v1486_v57  ;;  %v1868_v57 = vsel %vm215_vm1, %v3511_v31, 0.0  ;;  %v1872_v31 = vsel %vm215_vm1, %v3551_v46, 0.0 }
 0x332   : > { %v3568_v41 = vpop.f32.mrf.mxu2  ;;  %v3570_v43 = vpop.f32.mrf.mxu1 }
 0x333   : > { %1838 = vst.msk [vmem:[%s3481_s10 + $0x88] sm:$0xff] %vm215_vm1, %v3568_v41  ;;  %v1041_v8 = vpop.permute.xlu1 %1040  ;;  %v1369_v12 = vpop.permute.xlu2 %1368  ;;  %v1934_v28 = vmul.f32 %v3570_v43, %v3570_v43 }
 0x334   : > { %1108 = vst.msk [vmem:[#allocation3 + $0xe8] sm:$0xff] %vm1078_vm6, %v1041_v8  ;;  %v1974_v8 = vsel %vm215_vm1, %v1933_v20, 0.0 }
 0x335   : > { %1832 = vst.msk [vmem:[%s3481_s10 + $0x58] sm:$0xff] %vm215_vm1, %v3570_v43 }
 0x336   : > { %v1498_v3 = vpop.permute.xlu0 %1497 }
 0x337   : > { %1566 = vst.msk [vmem:[#allocation3 + $0xe0] sm:$0xff] %vm1537_vm10, %v1498_v3  ;;  %v1592_v47 = vld [vmem:[#allocation3 + $0xb0] sm:$0xff] }
 0x338   : > { %2165 = vmatmul.msk.f32.gmra.mxu2 %vm1607_vm11, %v1592_v47 }
 0x339   : > { %v1740_v49 = vpop.f32.mrf.mxu0 }
 0x33a   : > { %1826 = vst.msk [vmem:[%s3481_s10 + $0x28] sm:$0xff] %vm215_vm1, %v1740_v49  ;;  %v1862_v53 = vsel %vm215_vm1, %v1740_v49, 0.0  ;;  %v1928_v26 = vmul.f32 %v1740_v49, %v1740_v49  ;;  %v1976_v49 = vsel %vm215_vm1, %v1934_v28, 0.0 }
 0x33b   : > { %v1863_v56 = vadd.f32 %v1862_v53, %v1861_v18  ;;  %v1357_v59 = vpop.permute.xlu1 %1356  ;;  %v1043_v62 = vpop.permute.xlu2 %1042  ;;  %v1870_v18 = vsel %vm215_vm1, %v3525_v32, 0.0  ;;  %v1874_v32 = vsel %vm215_vm1, %v3570_v43, 0.0 }
 0x33c   : > { %v1964_v1 = vsel %vm215_vm1, %v1928_v26, 0.0  ;;  %1430 = vst.msk [vmem:[#allocation3 + $0xb8] sm:$0xff] %vm1406_vm9, %v1357_v59 }
 0x33d   : > { %v1965_v44 = vadd.f32 %v1964_v1, %v1963_v14  ;;  %1109 = vst.msk [vmem:[#allocation3 + $0xf0] sm:$0xff] %vm1078_vm6, %v1043_v62  ;;  %v1972_v14 = vsel %vm215_vm1, %v1932_v63, 0.0 }
 0x33e   : > { %v1238_v4 = vpop.permute.xlu0 %1237  ;;  %v1598_v5 = vld [vmem:[#allocation3 + $0xe0] sm:$0xff] }
 0x33f   : > { %1305 = vst.msk [vmem:[#allocation3 + $0xe8] sm:$0xff] %vm1275_vm8, %v1238_v4  ;;  %2171 = vmatmul.msk.f32.gmra.mxu3 %vm1607_vm11, %v1598_v5 }
 0x340   : > { %1436 = vst.msk [vmem:[#allocation3 + $0xe8] sm:$0xff] %vm1406_vm9, %v1369_v12 }
 0x343   : > { %v1500_v7 = vpop.permute.xlu1 %1499  ;;  %v1502_v23 = vpop.permute.xlu2 %1501 }
 0x344   : > { %1567 = vst.msk [vmem:[#allocation3 + $0xe8] sm:$0xff] %vm1537_vm10, %v1500_v7 }
 0x346   : > { %v1488_v9 = vpop.permute.xlu0 %1487 }
 0x347   : > { %1561 = vst.msk [vmem:[#allocation3 + $0xb8] sm:$0xff] %vm1537_vm10, %v1488_v9 }
 0x34b   : > { %v3592_v10 = vpop.f32.mrf.mxu2  ;;  %v1371_v55 = vpop.permute.xlu1 %1370  ;;  %v1599_v15 = vld [vmem:[#allocation3 + $0xe8] sm:$0xff] }
 0x34c   : > { %1839 = vst.msk [vmem:[%s3481_s10 + $0x90] sm:$0xff] %vm215_vm1, %v3592_v10  ;;  %2172 = vmatmul.msk.f32.gmra.mxu3 %vm1607_vm11, %v1599_v15  ;;  %v1373_v34 = vpop.permute.xlu2 %1372 }
 0x34e   : > { %v1240_v16 = vpop.permute.xlu0 %1239  ;;  %v1593_v19 = vld [vmem:[#allocation3 + $0xb8] sm:$0xff] }
 0x34f   : > { %1306 = vst.msk [vmem:[#allocation3 + $0xf0] sm:$0xff] %vm1275_vm8, %v1240_v16  ;;  %2166 = vmatmul.msk.f32.gmra.mxu2 %vm1607_vm11, %v1593_v19 }
 0x350   : > { %1437 = vst.msk [vmem:[#allocation3 + $0xf0] sm:$0xff] %vm1406_vm9, %v1371_v55 }
 0x351   : > { %1568 = vst.msk [vmem:[#allocation3 + $0xf0] sm:$0xff] %vm1537_vm10, %v1502_v23 }
 0x352   : > { %v3602_v21 = vpop.f32.mrf.mxu3  ;;  %v1761_v30 = vpop.f32.mrf.mxu1 }
 0x353   : > { %1845 = vst.msk [vmem:[%s3481_s10 + $0xc0] sm:$0xff] %vm215_vm1, %v3602_v21  ;;  %v1242_v33 = vpop.permute.xlu1 %1241  ;;  %v1935_v12 = vmul.f32 %v1761_v30, %v1761_v30  ;;  %v1876_v46 = vsel %vm215_vm1, %v1761_v30, 0.0 }
 0x354   : > { %1833 = vst.msk [vmem:[%s3481_s10 + $0x60] sm:$0xff] %vm215_vm1, %v1761_v30 }
 0x355   : > { %v1978_v59 = vsel %vm215_vm1, %v1935_v12, 0.0 }
 0x356   : > { %v1045_v25 = vpop.permute.xlu0 %1044 }
 0x357   : > { %1110 = vst.msk [vmem:[#allocation3 + $0xf8] sm:$0xff] %vm1078_vm6, %v1045_v25 }
 0x358   : > { %1307 = vst.msk [vmem:[#allocation3 + $0xf8] sm:$0xff] %vm1275_vm8, %v1242_v33  ;;  %v1600_v35 = vld [vmem:[#allocation3 + $0xf0] sm:$0xff]  ;;  %v1939_v33 = vmul.f32 %v3541_v22, %v3541_v22 }
 0x359   : > { %v1743_v36 = vpop.f32.mrf.mxu0  ;;  %1438 = vst.msk [vmem:[#allocation3 + $0xf8] sm:$0xff] %vm1406_vm9, %v1373_v34  ;;  %2173 = vmatmul.msk.f32.gmra.mxu3 %vm1607_vm11, %v1600_v35 }
 0x35a   : > { %1827 = vst.msk [vmem:[%s3481_s10 + $0x30] sm:$0xff] %vm215_vm1, %v1743_v36  ;;  %v1864_v29 = vsel %vm215_vm1, %v1743_v36, 0.0  ;;  %v1929_v50 = vmul.f32 %v1743_v36, %v1743_v36 }
 0x35b   : > { %v1865_v39 = vadd.f32 %v1864_v29, %v1863_v56  ;;  %v1884_v29 = vsel %vm215_vm1, %v3541_v22, 0.0 }
 0x35c   : > { %v1966_v40 = vsel %vm215_vm1, %v1929_v50, 0.0  ;;  %v1940_v50 = vmul.f32 %v3568_v41, %v3568_v41 }
 0x35d   : > { %v1967_v13 = vadd.f32 %v1966_v40, %v1965_v44 }
 0x35e   : > { %v1504_v42 = vpop.permute.xlu0 %1503  ;;  %v1988_v22 = vsel %vm215_vm1, %v1940_v50, 0.0 }
 0x35f   : > { %1569 = vst.msk [vmem:[#allocation3 + $0xf8] sm:$0xff] %vm1537_vm10, %v1504_v42  ;;  %v1986_v42 = vsel %vm215_vm1, %v1939_v33, 0.0 }
 0x366   : > { %v1601_v17 = vld [vmem:[#allocation3 + $0xf8] sm:$0xff] }
 0x367   : > { %2174 = vmatmul.msk.f32.gmra.mxu3 %vm1607_vm11, %v1601_v17  ;;  %v1886_v17 = vsel %vm215_vm1, %v3568_v41, 0.0 }
 0x36b   : > { %v3619_v61 = vpop.f32.mrf.mxu2 }
 0x36c   : > { %1840 = vst.msk [vmem:[%s3481_s10 + $0x98] sm:$0xff] %vm215_vm1, %v3619_v61 }
 0x372   : > { %v3624_v45 = vpop.f32.mrf.mxu3 }
 0x373   : > { %1846 = vst.msk [vmem:[%s3481_s10 + $0xc8] sm:$0xff] %vm215_vm1, %v3624_v45  ;;  %v1764_v48 = vpop.f32.mrf.mxu1 }
 0x374   : > { %1834 = vst.msk [vmem:[%s3481_s10 + $0x68] sm:$0xff] %vm215_vm1, %v1764_v48  ;;  %v1936_v53 = vmul.f32 %v1764_v48, %v1764_v48  ;;  %v1878_v62 = vsel %vm215_vm1, %v1764_v48, 0.0  ;;  %v1941_v48 = vmul.f32 %v3592_v10, %v3592_v10 }
 0x376   : > { %v1980_v43 = vsel %vm215_vm1, %v1936_v53, 0.0  ;;  %v1990_v41 = vsel %vm215_vm1, %v1941_v48, 0.0 }
 0x379   : > { %v1746_v54 = vpop.f32.mrf.mxu0 }
 0x37a   : > { %1828 = vst.msk [vmem:[%s3481_s10 + $0x38] sm:$0xff] %vm215_vm1, %v1746_v54  ;;  %v1866_v58 = vsel %vm215_vm1, %v1746_v54, 0.0  ;;  %v1930_v52 = vmul.f32 %v1746_v54, %v1746_v54 }
 0x37b   : > { %v1867_v60 = vadd.f32 %v1866_v58, %v1865_v39  ;;  %v1888_v58 = vsel %vm215_vm1, %v3592_v10, 0.0 }
 0x37c   : > { %v1968_v0 = vsel %vm215_vm1, %v1930_v52, 0.0  ;;  %v1942_v52 = vmul.f32 %v3619_v61, %v3619_v61 }
 0x37d   : > { %v1869_v2 = vadd.f32 %v1868_v57, %v1867_v60  ;;  %v1969_v6 = vadd.f32 %v1968_v0, %v1967_v13  ;;  %v1890_v0 = vsel %vm215_vm1, %v3619_v61, 0.0 }
 0x37e   : > { %v1992_v10 = vsel %vm215_vm1, %v1942_v52, 0.0 }
 0x37f   : > { %v1871_v24 = vadd.f32 %v1870_v18, %v1869_v2  ;;  %v1971_v27 = vadd.f32 %v1970_v11, %v1969_v6 }
 0x381   : > { %v1873_v37 = vadd.f32 %v1872_v31, %v1871_v24  ;;  %v1973_v38 = vadd.f32 %v1972_v14, %v1971_v27 }
 0x383   : > { %v1975_v3 = vadd.f32 %v1974_v8, %v1973_v38  ;;  %v1875_v47 = vadd.f32 %v1874_v32, %v1873_v37 }
 0x385   : > { %v1877_v26 = vadd.f32 %v1876_v46, %v1875_v47  ;;  %v1977_v56 = vadd.f32 %v1976_v49, %v1975_v3 }
 0x387   : > { %v1879_v1 = vadd.f32 %v1878_v62, %v1877_v26  ;;  %v1979_v44 = vadd.f32 %v1978_v59, %v1977_v56  ;;  %v1947_v26 = vmul.f32 %v3602_v21, %v3602_v21 }
 0x389   : > { %v1981_v4 = vadd.f32 %v1980_v43, %v1979_v44  ;;  %v1900_v44 = vsel %vm215_vm1, %v3602_v21, 0.0  ;;  %v1948_v43 = vmul.f32 %v3624_v45, %v3624_v45 }
 0x38b   : > { %v1767_v5 = vpop.f32.mrf.mxu1  ;;  %v1785_v7 = vpop.f32.mrf.mxu2  ;;  %v2004_v21 = vsel %vm215_vm1, %v1948_v43, 0.0 }
 0x38c   : > { %1835 = vst.msk [vmem:[%s3481_s10 + $0x70] sm:$0xff] %vm215_vm1, %v1767_v5  ;;  %v1937_v55 = vmul.f32 %v1767_v5, %v1767_v5  ;;  %v1880_v15 = vsel %vm215_vm1, %v1767_v5, 0.0  ;;  %v1943_v2 = vmul.f32 %v1785_v7, %v1785_v7  ;;  %v1892_v18 = vsel %vm215_vm1, %v1785_v7, 0.0 }
 0x38d   : > { %1841 = vst.msk [vmem:[%s3481_s10 + $0xa0] sm:$0xff] %vm215_vm1, %v1785_v7  ;;  %v1881_v16 = vadd.f32 %v1880_v15, %v1879_v1  ;;  %v1902_v15 = vsel %vm215_vm1, %v3624_v45, 0.0 }
 0x38e   : > { %v1982_v23 = vsel %vm215_vm1, %v1937_v55, 0.0  ;;  %v1994_v27 = vsel %vm215_vm1, %v1943_v2, 0.0  ;;  %v2002_v55 = vsel %vm215_vm1, %v1947_v26, 0.0 }
 0x38f   : > { %v1983_v35 = vadd.f32 %v1982_v23, %v1981_v4 }
 0x392   : > { %v3663_v9 = vpop.f32.mrf.mxu3 }
 0x393   : > { %1847 = vst.msk [vmem:[%s3481_s10 + $0xd0] sm:$0xff] %vm215_vm1, %v3663_v9  ;;  %v1949_v23 = vmul.f32 %v3663_v9, %v3663_v9 }
 0x3a3   : > { %v1770_v19 = vpop.f32.mrf.mxu1  ;;  %v1788_v30 = vpop.f32.mrf.mxu2 }
 0x3a4   : > { %1836 = vst.msk [vmem:[%s3481_s10 + $0x78] sm:$0xff] %vm215_vm1, %v1770_v19  ;;  %v1882_v25 = vsel %vm215_vm1, %v1770_v19, 0.0  ;;  %v1938_v34 = vmul.f32 %v1770_v19, %v1770_v19  ;;  %v1944_v61 = vmul.f32 %v1788_v30, %v1788_v30  ;;  %v1894_v38 = vsel %vm215_vm1, %v1788_v30, 0.0 }
 0x3a5   : > { %v1883_v36 = vadd.f32 %v1882_v25, %v1881_v16  ;;  %1842 = vst.msk [vmem:[%s3481_s10 + $0xa8] sm:$0xff] %vm215_vm1, %v1788_v30  ;;  %v1904_v30 = vsel %vm215_vm1, %v3663_v9, 0.0 }
 0x3a6   : > { %v1984_v39 = vsel %vm215_vm1, %v1938_v34, 0.0  ;;  %v1996_v3 = vsel %vm215_vm1, %v1944_v61, 0.0  ;;  %v2006_v34 = vsel %vm215_vm1, %v1949_v23, 0.0 }
 0x3a7   : > { %v1885_v40 = vadd.f32 %v1884_v29, %v1883_v36  ;;  %v1985_v13 = vadd.f32 %v1984_v39, %v1983_v35 }
 0x3a9   : > { %v1887_v54 = vadd.f32 %v1886_v17, %v1885_v40  ;;  %v1987_v51 = vadd.f32 %v1986_v42, %v1985_v13 }
 0x3aa   : > { %v1806_v60 = vpop.f32.mrf.mxu3 }
 0x3ab   : > { %v1889_v57 = vadd.f32 %v1888_v58, %v1887_v54  ;;  %v1989_v63 = vadd.f32 %v1988_v22, %v1987_v51  ;;  %1848 = vst.msk [vmem:[%s3481_s10 + $0xd8] sm:$0xff] %vm215_vm1, %v1806_v60  ;;  %v1950_v35 = vmul.f32 %v1806_v60, %v1806_v60  ;;  %v1906_v50 = vsel %vm215_vm1, %v1806_v60, 0.0 }
 0x3ad   : > { %v1991_v6 = vadd.f32 %v1990_v41, %v1989_v63  ;;  %v1891_v11 = vadd.f32 %v1890_v0, %v1889_v57  ;;  %v2008_v39 = vsel %vm215_vm1, %v1950_v35, 0.0 }
 0x3af   : > { %v1893_v20 = vadd.f32 %v1892_v18, %v1891_v11  ;;  %v1993_v24 = vadd.f32 %v1992_v10, %v1991_v6 }
 0x3b1   : > { %v1995_v14 = vadd.f32 %v1994_v27, %v1993_v24  ;;  %v1895_v12 = vadd.f32 %v1894_v38, %v1893_v20 }
 0x3b3   : > { %v1997_v49 = vadd.f32 %v1996_v3, %v1995_v14 }
 0x3bb   : > { %v1791_v31 = vpop.f32.mrf.mxu2 }
 0x3bc   : > { %1843 = vst.msk [vmem:[%s3481_s10 + $0xb0] sm:$0xff] %vm215_vm1, %v1791_v31  ;;  %v1945_v37 = vmul.f32 %v1791_v31, %v1791_v31  ;;  %v1896_v8 = vsel %vm215_vm1, %v1791_v31, 0.0 }
 0x3bd   : > { %v1897_v46 = vadd.f32 %v1896_v8, %v1895_v12 }
 0x3be   : > { %v1998_v47 = vsel %vm215_vm1, %v1945_v37, 0.0 }
 0x3bf   : > { %v1999_v62 = vadd.f32 %v1998_v47, %v1997_v49 }
 0x3c2   : > { %v1809_v28 = vpop.f32.mrf.mxu3 }
 0x3c3   : > { %1849 = vst.msk [vmem:[%s3481_s10 + $0xe0] sm:$0xff] %vm215_vm1, %v1809_v28  ;;  %v1951_v40 = vmul.f32 %v1809_v28, %v1809_v28  ;;  %v1908_v42 = vsel %vm215_vm1, %v1809_v28, 0.0 }
 0x3c5   : > { %v2010_v17 = vsel %vm215_vm1, %v1951_v40, 0.0 }
 0x3cf   : > { %v1812_v32 = vpop.f32.mrf.mxu3 }
 0x3d0   : > { %1850 = vst.msk [vmem:[%s3481_s10 + $0xe8] sm:$0xff] %vm215_vm1, %v1812_v32  ;;  %v1952_v48 = vmul.f32 %v1812_v32, %v1812_v32  ;;  %v1910_v51 = vsel %vm215_vm1, %v1812_v32, 0.0 }
 0x3d2   : > { %v1794_v53 = vpop.f32.mrf.mxu2  ;;  %v2012_v52 = vsel %vm215_vm1, %v1952_v48, 0.0 }
 0x3d3   : > { %1844 = vst.msk [vmem:[%s3481_s10 + $0xb8] sm:$0xff] %vm215_vm1, %v1794_v53  ;;  %v1898_v56 = vsel %vm215_vm1, %v1794_v53, 0.0  ;;  %v1946_v59 = vmul.f32 %v1794_v53, %v1794_v53 }
 0x3d4   : > { %v1899_v1 = vadd.f32 %v1898_v56, %v1897_v46 }
 0x3d5   : > { %v2000_v4 = vsel %vm215_vm1, %v1946_v59, 0.0 }
 0x3d6   : > { %v1901_v5 = vadd.f32 %v1900_v44, %v1899_v1  ;;  %v2001_v7 = vadd.f32 %v2000_v4, %v1999_v62 }
 0x3d8   : > { %v1903_v16 = vadd.f32 %v1902_v15, %v1901_v5  ;;  %v2003_v19 = vadd.f32 %v2002_v55, %v2001_v7 }
 0x3da   : > { %v1905_v33 = vadd.f32 %v1904_v30, %v1903_v16  ;;  %v2005_v25 = vadd.f32 %v2004_v21, %v2003_v19 }
 0x3dc   : > { %v2007_v36 = vadd.f32 %v2006_v34, %v2005_v25  ;;  %v1815_v29 = vpop.f32.mrf.mxu3  ;;  %v1907_v45 = vadd.f32 %v1906_v50, %v1905_v33 }
 0x3dd   : > { %1851 = vst.msk [vmem:[%s3481_s10 + $0xf0] sm:$0xff] %vm215_vm1, %v1815_v29  ;;  %v1953_v22 = vmul.f32 %v1815_v29, %v1815_v29  ;;  %v1912_v60 = vsel %vm215_vm1, %v1815_v29, 0.0 }
 0x3de   : > { %v2009_v13 = vadd.f32 %v2008_v39, %v2007_v36  ;;  %v1909_v9 = vadd.f32 %v1908_v42, %v1907_v45 }
 0x3df   : > { %v2014_v63 = vsel %vm215_vm1, %v1953_v22, 0.0 }
 0x3e0   : > { %v2011_v54 = vadd.f32 %v2010_v17, %v2009_v13  ;;  %v1911_v58 = vadd.f32 %v1910_v51, %v1909_v9 }
 0x3e2   : > { %v2013_v57 = vadd.f32 %v2012_v52, %v2011_v54  ;;  %v1913_v41 = vadd.f32 %v1912_v60, %v1911_v58 }
 0x3e4   : > { %v2015_v11 = vadd.f32 %v2014_v63, %v2013_v57 }
 0x3ea   : > { %v1818_v0 = vpop.f32.mrf.mxu3 }
 0x3eb   : > { %1852 = vst.msk [vmem:[%s3481_s10 + $0xf8] sm:$0xff] %vm215_vm1, %v1818_v0  ;;  %v1914_v2 = vsel %vm215_vm1, %v1818_v0, 0.0  ;;  %v1954_v6 = vmul.f32 %v1818_v0, %v1818_v0 }
 0x3ec   : > { %v1915_v10 = vadd.f32 %v1914_v2, %v1913_v41 }
 0x3ed   : > { %v2016_v18 = vsel %vm215_vm1, %v1954_v6, 0.0 }
 0x3ee   : > { %v1916_v20 = vrot.slane %v1915_v10, 4  ;;  %v2017_v24 = vadd.f32 %v2016_v18, %v2015_v11 }
 0x3f0   : > { %v1917_v27 = vadd.f32 %v1916_v20, %v1915_v10  ;;  %v2018_v14 = vrot.slane %v2017_v24, 4 }
 0x3f2   : > { %v1918_v31 = vrot.slane %v1917_v27, 2  ;;  %v2019_v28 = vadd.f32 %v2018_v14, %v2017_v24 }
 0x3f4   : > { %v1919_v61 = vadd.f32 %v1918_v31, %v1917_v27  ;;  %v2020_v37 = vrot.slane %v2019_v28, 2 }
 0x3f6   : > { %v1920_v38 = vrot.slane %v1919_v61, 1  ;;  %v2021_v8 = vadd.f32 %v2020_v37, %v2019_v28 }
 0x3f8   : > { %v1921_v32 = vadd.f32 %v1920_v38, %v1919_v61  ;;  %v2022_v12 = vrot.slane %v2021_v8, 1 }
 0x3fa   : > { %1922 = vst.msk [vmem:[%s171_s11] sm:$0x1] %vm255_vm0, %v1921_v32  ;;  %v2023_v3 = vadd.f32 %v2022_v12, %v2021_v8 }
 0x3fc   : > { %2024 = vst.msk [vmem:[%s171_s11 + $0x1] sm:$0x1] %vm255_vm0, %v2023_v3 }
 0x3fd   : > { %2271 = shalt.err (!%p2268_p3)
}
 0x3fe   : > { %2196 = dma.vmem_to_hbm [thread:$0]  (%p2375_p5), %s2047_s17, 32, %s2049_s19, %s2031_s16  }
 0x3ff PF: > { %p2202_p4 = scmp.ge.s32.totalorder %s2306_s15, 2  ;;  %s2068_s5 = sand.u32 1, %s2294_s12  }
 0x400   : > { %s2069_s10 = scalar_lea.sflag [#allocation5], %s2068_s5 }
 0x401   : > { %p2199_p7 = pnand %p2202_p4, %p2379_p6 }
 0x403   : > { %p2200_p8 = pneg %p2199_p7 }
 0x405   : > { %2289 = dma.done.wait (%p2200_p8), %s2069_s10, 32  }
 0x406   : > { %2291 = vsyncadd (%p2200_p8), %s2069_s10, 4294967264  ;;  %p14_p9 = scmp.ge.s32.totalorder %s2362_s18, 6   ;;  %s3783_s12 = smov %s2298_s13 }
 0x407   : > { %s3784_s13 = smov %s2302_s14  ;;  %s3785_s14 = smov %s2373_s21 }
 0x408   : > { %s3786_s15 = smov %s2362_s18  ;;  %16 = sbr.rel (!%p14_p9) target bundleno = 3 (0x3), region = 77 }
 0x40d   :  { %2075 = vsyncpa [#allocation5], 1 }
 0x40e   :  { %2077 = vsyncpa [#allocation5 + $0x1], 1 }

</bundles_post_ra>
